<compile_context>
chip_gen: v7x
topology: tpu7x:2x2x1
jax: 0.10.0
libtpu: 0.0.40
codegen_flags: <defaults>
</compile_context>

<pallas_src>
import numpy as np
import jax
import jax.numpy as jnp
from jax.experimental import pallas as pl
from jax.experimental.pallas import tpu as pltpu


def make_cbam_kernel(C, Cr, K, W, HW, HW_pad):
    half = K // 2

    def roll_lanes(v, off):
        # y[:, i] = v[:, (i + off) % HW_pad]   (== jnp.roll(v, -off, axis=1))
        amt = (-off) % HW_pad
        if amt == 0:
            return v
        return pltpu.roll(v, shift=amt, axis=1)

    def kernel(x_ref, w1t_ref, w2_ref, wsp_ref, colm_ref, rowm_ref, o_ref):
        # x_ref:    (1, C, HW_pad)   input image (one batch element)
        # w1t_ref:  (C, Cr)          first 1x1 conv weight, transposed
        # w2_ref:   (C, Cr)          second 1x1 conv weight (natural layout)
        # wsp_ref:  (K*K, 2, 1)      per-tap [w_max; w_avg] columns
        # colm_ref: (K, 2, HW_pad)   column validity masks per dx (f32 0/1)
        # rowm_ref: (K, 2, HW_pad)   row validity masks per dy (f32 0/1)
        x = x_ref[0].astype(jnp.float32)                      # (C, HW_pad)

        # ---------------- channel attention ----------------
        xv = x if HW_pad == HW else x[:, :HW]                 # drop pad lanes
        mx = jnp.max(xv, axis=1, keepdims=True)               # (C, 1)
        av = jnp.mean(xv, axis=1, keepdims=True)              # (C, 1)

        w1t = w1t_ref[...]                                    # (C, Cr)
        w2 = w2_ref[...]                                      # (C, Cr)

        def mlp(p):                                           # p: (C, 1)
            h = jnp.maximum(jnp.sum(w1t * p, axis=0, keepdims=True), 0.0)  # (1, Cr)
            return jnp.sum(w2 * h, axis=1, keepdims=True)                  # (C, 1)

        ch_att = jax.nn.sigmoid(mlp(mx) + mlp(av))            # (C, 1)

        # ---------------- spatial attention -----------------
        x1 = x * ch_att                                       # (C, HW_pad)
        cmax = jnp.max(x1, axis=0, keepdims=True)             # (1, HW_pad)
        cavg = jnp.mean(x1, axis=0, keepdims=True)            # (1, HW_pad)
        # Pack both pooled maps into one (2, HW_pad) array so every roll /
        # mask / mul / add processes both maps at once.
        row_iota = jax.lax.broadcasted_iota(jnp.int32, (2, HW_pad), 0)
        stacked = jnp.where(row_iota == 0, cmax, cavg)        # (2, HW_pad)

        # K column-masked dx-shifted copies (shared across all dy taps).
        sdx = []
        for ix in range(K):
            dx = ix - half
            if dx == 0:
                sdx.append(stacked)                           # dx=0 mask is all-ones
            else:
                sdx.append(colm_ref[ix] * roll_lanes(stacked, dx))

        acc = jnp.zeros((2, HW_pad), jnp.float32)
        for iy in range(K):
            dy = iy - half
            part = None
            for ix in range(K):
                w_col = wsp_ref[iy * K + ix]                  # (2, 1)
                term = w_col * sdx[ix]
                part = term if part is None else part + term
            acc = acc + rowm_ref[iy] * roll_lanes(part, dy * W)

        conv = jnp.sum(acc, axis=0, keepdims=True)            # (1, HW_pad)
        sp_att = jax.nn.sigmoid(conv)

        # x1 stays live across the conv (it lives in VMEM); store directly.
        o_ref[0] = (x1 * sp_att).astype(o_ref.dtype)

    return kernel


@jax.jit
def cbam_forward(x_nchw, w1, w2, wsp):
    """x_nchw: (B, C, H, W); w1: (Cr, C); w2: (C, Cr); wsp: (1, 2, K, K)."""
    B, C, H, W = x_nchw.shape
    Cr = w1.shape[0]
    K = wsp.shape[-1]
    half = K // 2
    HW = H * W
    HW_pad = ((HW + 127) // 128) * 128                        # lane-dense stores

    # Free contiguous reshape -- no HBM transpose on either side of the kernel.
    x_f = x_nchw.reshape(B, C, HW)
    if HW_pad != HW:
        x_f = jnp.pad(x_f, ((0, 0), (0, 0), (0, HW_pad - HW)))

    w1t = jnp.transpose(w1).astype(jnp.float32)               # (C, Cr)
    w2f = w2.astype(jnp.float32)                              # (C, Cr)
    # Per-tap weight columns: wsp_cols[t] = [[w_max[t]], [w_avg[t]]].
    wsp_cols = (jnp.transpose(wsp.reshape(2, K * K))
                .reshape(K * K, 2, 1).astype(jnp.float32))

    # Precomputed boundary masks (trace-time numpy constants, tiny).
    pos = np.arange(HW_pad)
    rr = pos // W
    cc = pos % W
    colm = np.zeros((K, 2, HW_pad), np.float32)
    rowm = np.zeros((K, 2, HW_pad), np.float32)
    for t in range(K):
        d = t - half
        colm[t, :, :] = ((cc + d >= 0) & (cc + d < W)).astype(np.float32)
        rowm[t, :, :] = ((rr + d >= 0) & (rr + d < H)).astype(np.float32)

    kernel = make_cbam_kernel(C, Cr, K, W, HW, HW_pad)

    # Explicit VMEM budget: double-buffered in/out blocks + f32 working copies.
    # (v5e scoped default is 16 MiB; clamp at 64 MiB so it is valid on v7x.
    #  Very large C*HW on v7x would need the HW-tiled two-pass variant.)
    blk = C * HW_pad * 4
    vmem_limit = int(min(64 * 1024 * 1024,
                         max(32 * 1024 * 1024, 8 * blk + (4 << 20))))

    out = pl.pallas_call(
        kernel,
        out_shape=jax.ShapeDtypeStruct((B, C, HW_pad), x_nchw.dtype),
        grid=(B,),
        in_specs=[
            pl.BlockSpec((1, C, HW_pad), lambda b: (b, 0, 0)),       # x
            pl.BlockSpec((C, Cr), lambda b: (0, 0)),                 # w1^T
            pl.BlockSpec((C, Cr), lambda b: (0, 0)),                 # w2
            pl.BlockSpec((K * K, 2, 1), lambda b: (0, 0, 0)),        # spatial weights
            pl.BlockSpec((K, 2, HW_pad), lambda b: (0, 0, 0)),       # col masks
            pl.BlockSpec((K, 2, HW_pad), lambda b: (0, 0, 0)),       # row masks
        ],
        out_specs=pl.BlockSpec((1, C, HW_pad), lambda b: (b, 0, 0)),
        compiler_params=pltpu.CompilerParams(
            # batch axis is independent -> shards across the 2 TCs on v7x
            # (keep B >= 2 per call there, or add a second parallel axis).
            dimension_semantics=("parallel",),
            vmem_limit_bytes=vmem_limit),
    )(x_f, w1t, w2f, wsp_cols, jnp.asarray(colm), jnp.asarray(rowm))

    if HW_pad != HW:
        out = out[:, :, :HW]
    return out.reshape(B, C, H, W)


def cbam_reference(x, w1, w2, wsp):
    """Pure-JAX NCHW reference matching the PyTorch module."""
    mx = jnp.max(x, axis=(2, 3), keepdims=True)
    av = jnp.mean(x, axis=(2, 3), keepdims=True)

    def mlp(p):
        p2 = p[:, :, 0, 0]                                    # (B, C)
        h = jnp.maximum(p2 @ w1.T, 0.0)                       # (B, Cr)
        o = h @ w2.T                                          # (B, C)
        return o[:, :, None, None]

    ch = jax.nn.sigmoid(mlp(mx) + mlp(av))
    x1 = ch * x
    cmax = jnp.max(x1, axis=1, keepdims=True)
    cavg = jnp.mean(x1, axis=1, keepdims=True)
    stacked = jnp.concatenate([cmax, cavg], axis=1)           # (B, 2, H, W)
    half = wsp.shape[-1] // 2
    conv = jax.lax.conv_general_dilated(
        stacked, wsp, window_strides=(1, 1),
        padding=((half, half), (half, half)),
        dimension_numbers=("NCHW", "OIHW", "NCHW"))
    sp = jax.nn.sigmoid(conv)
    return sp * x1


if __name__ == "__main__":
    B, C, H, W = 2, 32, 16, 16
    reduction, K = 16, 7
    Cr = C // reduction

    key = jax.random.PRNGKey(0)
    kx, k1, k2, k3 = jax.random.split(key, 4)
    x = jax.random.normal(kx, (B, C, H, W), dtype=jnp.float32)
    w1 = jax.random.normal(k1, (Cr, C), dtype=jnp.float32) * 0.1      # Conv2d(C, C//r, 1)
    w2 = jax.random.normal(k2, (C, Cr), dtype=jnp.float32) * 0.1      # Conv2d(C//r, C, 1)
    wsp = jax.random.normal(k3, (1, 2, K, K), dtype=jnp.float32) * 0.1  # Conv2d(2, 1, 7)

    out = jax.block_until_ready(cbam_forward(x, w1, w2, wsp))
    ref = jax.block_until_ready(cbam_reference(x, w1, w2, wsp))
    assert out.shape == ref.shape == (B, C, H, W)
    err = float(jnp.max(jnp.abs(out - ref)))
    assert jnp.allclose(out, ref, atol=1e-4, rtol=1e-4), err

    print("KERNEL_OK")
</pallas_src>

<mosaic_0001>
module attributes {stable_mosaic.version = 11 : i64} {
  func.func @kernel(%arg0: i32, %arg1: memref<1x32x256xf32, #tpu.memory_space<vmem>>, %arg2: memref<32x2xf32, #tpu.memory_space<vmem>>, %arg3: memref<32x2xf32, #tpu.memory_space<vmem>>, %arg4: memref<49x2x1xf32, #tpu.memory_space<vmem>>, %arg5: memref<7x2x256xf32, #tpu.memory_space<vmem>>, %arg6: memref<7x2x256xf32, #tpu.memory_space<vmem>>, %arg7: memref<1x32x256xf32, #tpu.memory_space<vmem>>) attributes {dimension_semantics = [#tpu.dimension_semantics<parallel>], iteration_bounds = array<i64: 2>, scalar_prefetch = 0 : i64, scratch_operands = 0 : i64, tpu.core_type = #tpu.core_type<tc>, window_params = [{transform_indices = @transform_0, window_bounds = array<i64: 1, 32, 256>}, {pipeline_mode = #tpu.pipeline_mode<synchronous>, transform_indices = @transform_1, window_bounds = array<i64: 32, 2>}, {pipeline_mode = #tpu.pipeline_mode<synchronous>, transform_indices = @transform_2, window_bounds = array<i64: 32, 2>}, {pipeline_mode = #tpu.pipeline_mode<synchronous>, transform_indices = @transform_3, window_bounds = array<i64: 49, 2, 1>}, {pipeline_mode = #tpu.pipeline_mode<synchronous>, transform_indices = @transform_4, window_bounds = array<i64: 7, 2, 256>}, {pipeline_mode = #tpu.pipeline_mode<synchronous>, transform_indices = @transform_5, window_bounds = array<i64: 7, 2, 256>}, {transform_indices = @transform_6, window_bounds = array<i64: 1, 32, 256>}]} {
    %c0 = arith.constant 0 : index
    %c0_0 = arith.constant 0 : index
    %c0_1 = arith.constant 0 : index
    %0 = vector.load %arg1[%c0, %c0_0, %c0_1] : memref<1x32x256xf32, #tpu.memory_space<vmem>>, vector<1x32x256xf32>
    %1 = vector.shape_cast %0 : vector<1x32x256xf32> to vector<32x256xf32>
    %cst = arith.constant dense<0xFF800000> : vector<32xf32>
    %2 = vector.multi_reduction <maximumf>, %1, %cst [1] : vector<32x256xf32> to vector<32xf32>
    %3 = vector.shape_cast %2 : vector<32xf32> to vector<32x1xf32>
    %cst_2 = arith.constant dense<0.000000e+00> : vector<32xf32>
    %4 = vector.multi_reduction <add>, %1, %cst_2 [1] : vector<32x256xf32> to vector<32xf32>
    %5 = vector.shape_cast %4 : vector<32xf32> to vector<32x1xf32>
    %cst_3 = arith.constant 2.560000e+02 : f32
    %6 = vector.broadcast %cst_3 : f32 to vector<32x1xf32>
    %7 = arith.divf %5, %6 : vector<32x1xf32>
    %c0_4 = arith.constant 0 : index
    %c0_5 = arith.constant 0 : index
    %8 = vector.load %arg2[%c0_4, %c0_5] : memref<32x2xf32, #tpu.memory_space<vmem>>, vector<32x2xf32>
    %c0_6 = arith.constant 0 : index
    %c0_7 = arith.constant 0 : index
    %9 = vector.load %arg3[%c0_6, %c0_7] : memref<32x2xf32, #tpu.memory_space<vmem>>, vector<32x2xf32>
    %10 = vector.broadcast %3 : vector<32x1xf32> to vector<32x2xf32>
    %11 = arith.mulf %8, %10 : vector<32x2xf32>
    %cst_8 = arith.constant dense<0.000000e+00> : vector<2xf32>
    %12 = vector.multi_reduction <add>, %11, %cst_8 [0] : vector<32x2xf32> to vector<2xf32>
    %13 = vector.shape_cast %12 : vector<2xf32> to vector<1x2xf32>
    %cst_9 = arith.constant 0.000000e+00 : f32
    %14 = vector.broadcast %cst_9 : f32 to vector<1x2xf32>
    %15 = arith.maximumf %13, %14 : vector<1x2xf32>
    %16 = vector.broadcast %15 : vector<1x2xf32> to vector<32x2xf32>
    %17 = arith.mulf %9, %16 : vector<32x2xf32>
    %cst_10 = arith.constant dense<0.000000e+00> : vector<32xf32>
    %18 = vector.multi_reduction <add>, %17, %cst_10 [1] : vector<32x2xf32> to vector<32xf32>
    %19 = vector.shape_cast %18 : vector<32xf32> to vector<32x1xf32>
    %20 = vector.broadcast %7 : vector<32x1xf32> to vector<32x2xf32>
    %21 = arith.mulf %8, %20 : vector<32x2xf32>
    %cst_11 = arith.constant dense<0.000000e+00> : vector<2xf32>
    %22 = vector.multi_reduction <add>, %21, %cst_11 [0] : vector<32x2xf32> to vector<2xf32>
    %23 = vector.shape_cast %22 : vector<2xf32> to vector<1x2xf32>
    %cst_12 = arith.constant 0.000000e+00 : f32
    %24 = vector.broadcast %cst_12 : f32 to vector<1x2xf32>
    %25 = arith.maximumf %23, %24 : vector<1x2xf32>
    %26 = vector.broadcast %25 : vector<1x2xf32> to vector<32x2xf32>
    %27 = arith.mulf %9, %26 : vector<32x2xf32>
    %cst_13 = arith.constant dense<0.000000e+00> : vector<32xf32>
    %28 = vector.multi_reduction <add>, %27, %cst_13 [1] : vector<32x2xf32> to vector<32xf32>
    %29 = vector.shape_cast %28 : vector<32xf32> to vector<32x1xf32>
    %30 = arith.addf %19, %29 : vector<32x1xf32>
    %31 = arith.negf %30 : vector<32x1xf32>
    %32 = math.exp %31 : vector<32x1xf32>
    %cst_14 = arith.constant 1.000000e+00 : f32
    %33 = vector.broadcast %cst_14 : f32 to vector<32x1xf32>
    %34 = arith.addf %33, %32 : vector<32x1xf32>
    %35 = arith.divf %33, %34 : vector<32x1xf32>
    %36 = vector.broadcast %35 : vector<32x1xf32> to vector<32x256xf32>
    %37 = arith.mulf %1, %36 : vector<32x256xf32>
    %cst_15 = arith.constant dense<0xFF800000> : vector<256xf32>
    %38 = vector.multi_reduction <maximumf>, %37, %cst_15 [0] : vector<32x256xf32> to vector<256xf32>
    %39 = vector.shape_cast %38 : vector<256xf32> to vector<1x256xf32>
    %cst_16 = arith.constant dense<0.000000e+00> : vector<256xf32>
    %40 = vector.multi_reduction <add>, %37, %cst_16 [0] : vector<32x256xf32> to vector<256xf32>
    %41 = vector.shape_cast %40 : vector<256xf32> to vector<1x256xf32>
    %cst_17 = arith.constant 3.200000e+01 : f32
    %42 = vector.broadcast %cst_17 : f32 to vector<1x256xf32>
    %43 = arith.divf %41, %42 : vector<1x256xf32>
    %44 = tpu.iota {dimensions = array<i32: 0>} : vector<2x256xi32>
    %c0_i32 = arith.constant 0 : i32
    %45 = vector.broadcast %c0_i32 : i32 to vector<2x256xi32>
    %46 = arith.cmpi eq, %44, %45 : vector<2x256xi32>
    %47 = vector.shape_cast %39 : vector<1x256xf32> to vector<1x256xf32>
    %48 = vector.broadcast %47 : vector<1x256xf32> to vector<2x256xf32>
    %49 = vector.shape_cast %43 : vector<1x256xf32> to vector<1x256xf32>
    %50 = vector.broadcast %49 : vector<1x256xf32> to vector<2x256xf32>
    %51 = arith.select %46, %48, %50 : vector<2x256xi1>, vector<2x256xf32>
    %c0_18 = arith.constant 0 : index
    %c0_19 = arith.constant 0 : index
    %c0_20 = arith.constant 0 : index
    %52 = vector.load %arg5[%c0_18, %c0_19, %c0_20] : memref<7x2x256xf32, #tpu.memory_space<vmem>>, vector<1x2x256xf32>
    %53 = vector.shape_cast %52 : vector<1x2x256xf32> to vector<2x256xf32>
    %c3_i32 = arith.constant 3 : i32
    %54 = tpu.dynamic_rotate %51 by %c3_i32 dim 1 : vector<2x256xf32>, i32 -> vector<2x256xf32>
    %55 = arith.mulf %53, %54 : vector<2x256xf32>
    %c1 = arith.constant 1 : index
    %c0_21 = arith.constant 0 : index
    %c0_22 = arith.constant 0 : index
    %56 = vector.load %arg5[%c1, %c0_21, %c0_22] : memref<7x2x256xf32, #tpu.memory_space<vmem>>, vector<1x2x256xf32>
    %57 = vector.shape_cast %56 : vector<1x2x256xf32> to vector<2x256xf32>
    %c2_i32 = arith.constant 2 : i32
    %58 = tpu.dynamic_rotate %51 by %c2_i32 dim 1 : vector<2x256xf32>, i32 -> vector<2x256xf32>
    %59 = arith.mulf %57, %58 : vector<2x256xf32>
    %c2 = arith.constant 2 : index
    %c0_23 = arith.constant 0 : index
    %c0_24 = arith.constant 0 : index
    %60 = vector.load %arg5[%c2, %c0_23, %c0_24] : memref<7x2x256xf32, #tpu.memory_space<vmem>>, vector<1x2x256xf32>
    %61 = vector.shape_cast %60 : vector<1x2x256xf32> to vector<2x256xf32>
    %c1_i32 = arith.constant 1 : i32
    %62 = tpu.dynamic_rotate %51 by %c1_i32 dim 1 : vector<2x256xf32>, i32 -> vector<2x256xf32>
    %63 = arith.mulf %61, %62 : vector<2x256xf32>
    %c4 = arith.constant 4 : index
    %c0_25 = arith.constant 0 : index
    %c0_26 = arith.constant 0 : index
    %64 = vector.load %arg5[%c4, %c0_25, %c0_26] : memref<7x2x256xf32, #tpu.memory_space<vmem>>, vector<1x2x256xf32>
    %65 = vector.shape_cast %64 : vector<1x2x256xf32> to vector<2x256xf32>
    %c255_i32 = arith.constant 255 : i32
    %66 = tpu.dynamic_rotate %51 by %c255_i32 dim 1 : vector<2x256xf32>, i32 -> vector<2x256xf32>
    %67 = arith.mulf %65, %66 : vector<2x256xf32>
    %c5 = arith.constant 5 : index
    %c0_27 = arith.constant 0 : index
    %c0_28 = arith.constant 0 : index
    %68 = vector.load %arg5[%c5, %c0_27, %c0_28] : memref<7x2x256xf32, #tpu.memory_space<vmem>>, vector<1x2x256xf32>
    %69 = vector.shape_cast %68 : vector<1x2x256xf32> to vector<2x256xf32>
    %c254_i32 = arith.constant 254 : i32
    %70 = tpu.dynamic_rotate %51 by %c254_i32 dim 1 : vector<2x256xf32>, i32 -> vector<2x256xf32>
    %71 = arith.mulf %69, %70 : vector<2x256xf32>
    %c6 = arith.constant 6 : index
    %c0_29 = arith.constant 0 : index
    %c0_30 = arith.constant 0 : index
    %72 = vector.load %arg5[%c6, %c0_29, %c0_30] : memref<7x2x256xf32, #tpu.memory_space<vmem>>, vector<1x2x256xf32>
    %73 = vector.shape_cast %72 : vector<1x2x256xf32> to vector<2x256xf32>
    %c253_i32 = arith.constant 253 : i32
    %74 = tpu.dynamic_rotate %51 by %c253_i32 dim 1 : vector<2x256xf32>, i32 -> vector<2x256xf32>
    %75 = arith.mulf %73, %74 : vector<2x256xf32>
    %cst_31 = arith.constant 0.000000e+00 : f32
    %76 = vector.broadcast %cst_31 : f32 to vector<2x256xf32>
    %c0_32 = arith.constant 0 : index
    %c0_33 = arith.constant 0 : index
    %c0_34 = arith.constant 0 : index
    %77 = vector.load %arg4[%c0_32, %c0_33, %c0_34] : memref<49x2x1xf32, #tpu.memory_space<vmem>>, vector<1x2x1xf32>
    %78 = vector.shape_cast %77 : vector<1x2x1xf32> to vector<2x1xf32>
    %79 = vector.broadcast %78 : vector<2x1xf32> to vector<2x256xf32>
    %80 = arith.mulf %79, %55 : vector<2x256xf32>
    %c1_35 = arith.constant 1 : index
    %c0_36 = arith.constant 0 : index
    %c0_37 = arith.constant 0 : index
    %81 = vector.load %arg4[%c1_35, %c0_36, %c0_37] : memref<49x2x1xf32, #tpu.memory_space<vmem>>, vector<1x2x1xf32>
    %82 = vector.shape_cast %81 : vector<1x2x1xf32> to vector<2x1xf32>
    %83 = vector.broadcast %82 : vector<2x1xf32> to vector<2x256xf32>
    %84 = arith.mulf %83, %59 : vector<2x256xf32>
    %85 = arith.addf %80, %84 : vector<2x256xf32>
    %c2_38 = arith.constant 2 : index
    %c0_39 = arith.constant 0 : index
    %c0_40 = arith.constant 0 : index
    %86 = vector.load %arg4[%c2_38, %c0_39, %c0_40] : memref<49x2x1xf32, #tpu.memory_space<vmem>>, vector<1x2x1xf32>
    %87 = vector.shape_cast %86 : vector<1x2x1xf32> to vector<2x1xf32>
    %88 = vector.broadcast %87 : vector<2x1xf32> to vector<2x256xf32>
    %89 = arith.mulf %88, %63 : vector<2x256xf32>
    %90 = arith.addf %85, %89 : vector<2x256xf32>
    %c3 = arith.constant 3 : index
    %c0_41 = arith.constant 0 : index
    %c0_42 = arith.constant 0 : index
    %91 = vector.load %arg4[%c3, %c0_41, %c0_42] : memref<49x2x1xf32, #tpu.memory_space<vmem>>, vector<1x2x1xf32>
    %92 = vector.shape_cast %91 : vector<1x2x1xf32> to vector<2x1xf32>
    %93 = vector.broadcast %92 : vector<2x1xf32> to vector<2x256xf32>
    %94 = arith.mulf %93, %51 : vector<2x256xf32>
    %95 = arith.addf %90, %94 : vector<2x256xf32>
    %c4_43 = arith.constant 4 : index
    %c0_44 = arith.constant 0 : index
    %c0_45 = arith.constant 0 : index
    %96 = vector.load %arg4[%c4_43, %c0_44, %c0_45] : memref<49x2x1xf32, #tpu.memory_space<vmem>>, vector<1x2x1xf32>
    %97 = vector.shape_cast %96 : vector<1x2x1xf32> to vector<2x1xf32>
    %98 = vector.broadcast %97 : vector<2x1xf32> to vector<2x256xf32>
    %99 = arith.mulf %98, %67 : vector<2x256xf32>
    %100 = arith.addf %95, %99 : vector<2x256xf32>
    %c5_46 = arith.constant 5 : index
    %c0_47 = arith.constant 0 : index
    %c0_48 = arith.constant 0 : index
    %101 = vector.load %arg4[%c5_46, %c0_47, %c0_48] : memref<49x2x1xf32, #tpu.memory_space<vmem>>, vector<1x2x1xf32>
    %102 = vector.shape_cast %101 : vector<1x2x1xf32> to vector<2x1xf32>
    %103 = vector.broadcast %102 : vector<2x1xf32> to vector<2x256xf32>
    %104 = arith.mulf %103, %71 : vector<2x256xf32>
    %105 = arith.addf %100, %104 : vector<2x256xf32>
    %c6_49 = arith.constant 6 : index
    %c0_50 = arith.constant 0 : index
    %c0_51 = arith.constant 0 : index
    %106 = vector.load %arg4[%c6_49, %c0_50, %c0_51] : memref<49x2x1xf32, #tpu.memory_space<vmem>>, vector<1x2x1xf32>
    %107 = vector.shape_cast %106 : vector<1x2x1xf32> to vector<2x1xf32>
    %108 = vector.broadcast %107 : vector<2x1xf32> to vector<2x256xf32>
    %109 = arith.mulf %108, %75 : vector<2x256xf32>
    %110 = arith.addf %105, %109 : vector<2x256xf32>
    %c0_52 = arith.constant 0 : index
    %c0_53 = arith.constant 0 : index
    %c0_54 = arith.constant 0 : index
    %111 = vector.load %arg6[%c0_52, %c0_53, %c0_54] : memref<7x2x256xf32, #tpu.memory_space<vmem>>, vector<1x2x256xf32>
    %112 = vector.shape_cast %111 : vector<1x2x256xf32> to vector<2x256xf32>
    %c48_i32 = arith.constant 48 : i32
    %113 = tpu.dynamic_rotate %110 by %c48_i32 dim 1 : vector<2x256xf32>, i32 -> vector<2x256xf32>
    %114 = arith.mulf %112, %113 : vector<2x256xf32>
    %115 = arith.addf %76, %114 : vector<2x256xf32>
    %c7 = arith.constant 7 : index
    %c0_55 = arith.constant 0 : index
    %c0_56 = arith.constant 0 : index
    %116 = vector.load %arg4[%c7, %c0_55, %c0_56] : memref<49x2x1xf32, #tpu.memory_space<vmem>>, vector<1x2x1xf32>
    %117 = vector.shape_cast %116 : vector<1x2x1xf32> to vector<2x1xf32>
    %118 = vector.broadcast %117 : vector<2x1xf32> to vector<2x256xf32>
    %119 = arith.mulf %118, %55 : vector<2x256xf32>
    %c8 = arith.constant 8 : index
    %c0_57 = arith.constant 0 : index
    %c0_58 = arith.constant 0 : index
    %120 = vector.load %arg4[%c8, %c0_57, %c0_58] : memref<49x2x1xf32, #tpu.memory_space<vmem>>, vector<1x2x1xf32>
    %121 = vector.shape_cast %120 : vector<1x2x1xf32> to vector<2x1xf32>
    %122 = vector.broadcast %121 : vector<2x1xf32> to vector<2x256xf32>
    %123 = arith.mulf %122, %59 : vector<2x256xf32>
    %124 = arith.addf %119, %123 : vector<2x256xf32>
    %c9 = arith.constant 9 : index
    %c0_59 = arith.constant 0 : index
    %c0_60 = arith.constant 0 : index
    %125 = vector.load %arg4[%c9, %c0_59, %c0_60] : memref<49x2x1xf32, #tpu.memory_space<vmem>>, vector<1x2x1xf32>
    %126 = vector.shape_cast %125 : vector<1x2x1xf32> to vector<2x1xf32>
    %127 = vector.broadcast %126 : vector<2x1xf32> to vector<2x256xf32>
    %128 = arith.mulf %127, %63 : vector<2x256xf32>
    %129 = arith.addf %124, %128 : vector<2x256xf32>
    %c10 = arith.constant 10 : index
    %c0_61 = arith.constant 0 : index
    %c0_62 = arith.constant 0 : index
    %130 = vector.load %arg4[%c10, %c0_61, %c0_62] : memref<49x2x1xf32, #tpu.memory_space<vmem>>, vector<1x2x1xf32>
    %131 = vector.shape_cast %130 : vector<1x2x1xf32> to vector<2x1xf32>
    %132 = vector.broadcast %131 : vector<2x1xf32> to vector<2x256xf32>
    %133 = arith.mulf %132, %51 : vector<2x256xf32>
    %134 = arith.addf %129, %133 : vector<2x256xf32>
    %c11 = arith.constant 11 : index
    %c0_63 = arith.constant 0 : index
    %c0_64 = arith.constant 0 : index
    %135 = vector.load %arg4[%c11, %c0_63, %c0_64] : memref<49x2x1xf32, #tpu.memory_space<vmem>>, vector<1x2x1xf32>
    %136 = vector.shape_cast %135 : vector<1x2x1xf32> to vector<2x1xf32>
    %137 = vector.broadcast %136 : vector<2x1xf32> to vector<2x256xf32>
    %138 = arith.mulf %137, %67 : vector<2x256xf32>
    %139 = arith.addf %134, %138 : vector<2x256xf32>
    %c12 = arith.constant 12 : index
    %c0_65 = arith.constant 0 : index
    %c0_66 = arith.constant 0 : index
    %140 = vector.load %arg4[%c12, %c0_65, %c0_66] : memref<49x2x1xf32, #tpu.memory_space<vmem>>, vector<1x2x1xf32>
    %141 = vector.shape_cast %140 : vector<1x2x1xf32> to vector<2x1xf32>
    %142 = vector.broadcast %141 : vector<2x1xf32> to vector<2x256xf32>
    %143 = arith.mulf %142, %71 : vector<2x256xf32>
    %144 = arith.addf %139, %143 : vector<2x256xf32>
    %c13 = arith.constant 13 : index
    %c0_67 = arith.constant 0 : index
    %c0_68 = arith.constant 0 : index
    %145 = vector.load %arg4[%c13, %c0_67, %c0_68] : memref<49x2x1xf32, #tpu.memory_space<vmem>>, vector<1x2x1xf32>
    %146 = vector.shape_cast %145 : vector<1x2x1xf32> to vector<2x1xf32>
    %147 = vector.broadcast %146 : vector<2x1xf32> to vector<2x256xf32>
    %148 = arith.mulf %147, %75 : vector<2x256xf32>
    %149 = arith.addf %144, %148 : vector<2x256xf32>
    %c1_69 = arith.constant 1 : index
    %c0_70 = arith.constant 0 : index
    %c0_71 = arith.constant 0 : index
    %150 = vector.load %arg6[%c1_69, %c0_70, %c0_71] : memref<7x2x256xf32, #tpu.memory_space<vmem>>, vector<1x2x256xf32>
    %151 = vector.shape_cast %150 : vector<1x2x256xf32> to vector<2x256xf32>
    %c32_i32 = arith.constant 32 : i32
    %152 = tpu.dynamic_rotate %149 by %c32_i32 dim 1 : vector<2x256xf32>, i32 -> vector<2x256xf32>
    %153 = arith.mulf %151, %152 : vector<2x256xf32>
    %154 = arith.addf %115, %153 : vector<2x256xf32>
    %c14 = arith.constant 14 : index
    %c0_72 = arith.constant 0 : index
    %c0_73 = arith.constant 0 : index
    %155 = vector.load %arg4[%c14, %c0_72, %c0_73] : memref<49x2x1xf32, #tpu.memory_space<vmem>>, vector<1x2x1xf32>
    %156 = vector.shape_cast %155 : vector<1x2x1xf32> to vector<2x1xf32>
    %157 = vector.broadcast %156 : vector<2x1xf32> to vector<2x256xf32>
    %158 = arith.mulf %157, %55 : vector<2x256xf32>
    %c15 = arith.constant 15 : index
    %c0_74 = arith.constant 0 : index
    %c0_75 = arith.constant 0 : index
    %159 = vector.load %arg4[%c15, %c0_74, %c0_75] : memref<49x2x1xf32, #tpu.memory_space<vmem>>, vector<1x2x1xf32>
    %160 = vector.shape_cast %159 : vector<1x2x1xf32> to vector<2x1xf32>
    %161 = vector.broadcast %160 : vector<2x1xf32> to vector<2x256xf32>
    %162 = arith.mulf %161, %59 : vector<2x256xf32>
    %163 = arith.addf %158, %162 : vector<2x256xf32>
    %c16 = arith.constant 16 : index
    %c0_76 = arith.constant 0 : index
    %c0_77 = arith.constant 0 : index
    %164 = vector.load %arg4[%c16, %c0_76, %c0_77] : memref<49x2x1xf32, #tpu.memory_space<vmem>>, vector<1x2x1xf32>
    %165 = vector.shape_cast %164 : vector<1x2x1xf32> to vector<2x1xf32>
    %166 = vector.broadcast %165 : vector<2x1xf32> to vector<2x256xf32>
    %167 = arith.mulf %166, %63 : vector<2x256xf32>
    %168 = arith.addf %163, %167 : vector<2x256xf32>
    %c17 = arith.constant 17 : index
    %c0_78 = arith.constant 0 : index
    %c0_79 = arith.constant 0 : index
    %169 = vector.load %arg4[%c17, %c0_78, %c0_79] : memref<49x2x1xf32, #tpu.memory_space<vmem>>, vector<1x2x1xf32>
    %170 = vector.shape_cast %169 : vector<1x2x1xf32> to vector<2x1xf32>
    %171 = vector.broadcast %170 : vector<2x1xf32> to vector<2x256xf32>
    %172 = arith.mulf %171, %51 : vector<2x256xf32>
    %173 = arith.addf %168, %172 : vector<2x256xf32>
    %c18 = arith.constant 18 : index
    %c0_80 = arith.constant 0 : index
    %c0_81 = arith.constant 0 : index
    %174 = vector.load %arg4[%c18, %c0_80, %c0_81] : memref<49x2x1xf32, #tpu.memory_space<vmem>>, vector<1x2x1xf32>
    %175 = vector.shape_cast %174 : vector<1x2x1xf32> to vector<2x1xf32>
    %176 = vector.broadcast %175 : vector<2x1xf32> to vector<2x256xf32>
    %177 = arith.mulf %176, %67 : vector<2x256xf32>
    %178 = arith.addf %173, %177 : vector<2x256xf32>
    %c19 = arith.constant 19 : index
    %c0_82 = arith.constant 0 : index
    %c0_83 = arith.constant 0 : index
    %179 = vector.load %arg4[%c19, %c0_82, %c0_83] : memref<49x2x1xf32, #tpu.memory_space<vmem>>, vector<1x2x1xf32>
    %180 = vector.shape_cast %179 : vector<1x2x1xf32> to vector<2x1xf32>
    %181 = vector.broadcast %180 : vector<2x1xf32> to vector<2x256xf32>
    %182 = arith.mulf %181, %71 : vector<2x256xf32>
    %183 = arith.addf %178, %182 : vector<2x256xf32>
    %c20 = arith.constant 20 : index
    %c0_84 = arith.constant 0 : index
    %c0_85 = arith.constant 0 : index
    %184 = vector.load %arg4[%c20, %c0_84, %c0_85] : memref<49x2x1xf32, #tpu.memory_space<vmem>>, vector<1x2x1xf32>
    %185 = vector.shape_cast %184 : vector<1x2x1xf32> to vector<2x1xf32>
    %186 = vector.broadcast %185 : vector<2x1xf32> to vector<2x256xf32>
    %187 = arith.mulf %186, %75 : vector<2x256xf32>
    %188 = arith.addf %183, %187 : vector<2x256xf32>
    %c2_86 = arith.constant 2 : index
    %c0_87 = arith.constant 0 : index
    %c0_88 = arith.constant 0 : index
    %189 = vector.load %arg6[%c2_86, %c0_87, %c0_88] : memref<7x2x256xf32, #tpu.memory_space<vmem>>, vector<1x2x256xf32>
    %190 = vector.shape_cast %189 : vector<1x2x256xf32> to vector<2x256xf32>
    %c16_i32 = arith.constant 16 : i32
    %191 = tpu.dynamic_rotate %188 by %c16_i32 dim 1 : vector<2x256xf32>, i32 -> vector<2x256xf32>
    %192 = arith.mulf %190, %191 : vector<2x256xf32>
    %193 = arith.addf %154, %192 : vector<2x256xf32>
    %c21 = arith.constant 21 : index
    %c0_89 = arith.constant 0 : index
    %c0_90 = arith.constant 0 : index
    %194 = vector.load %arg4[%c21, %c0_89, %c0_90] : memref<49x2x1xf32, #tpu.memory_space<vmem>>, vector<1x2x1xf32>
    %195 = vector.shape_cast %194 : vector<1x2x1xf32> to vector<2x1xf32>
    %196 = vector.broadcast %195 : vector<2x1xf32> to vector<2x256xf32>
    %197 = arith.mulf %196, %55 : vector<2x256xf32>
    %c22 = arith.constant 22 : index
    %c0_91 = arith.constant 0 : index
    %c0_92 = arith.constant 0 : index
    %198 = vector.load %arg4[%c22, %c0_91, %c0_92] : memref<49x2x1xf32, #tpu.memory_space<vmem>>, vector<1x2x1xf32>
    %199 = vector.shape_cast %198 : vector<1x2x1xf32> to vector<2x1xf32>
    %200 = vector.broadcast %199 : vector<2x1xf32> to vector<2x256xf32>
    %201 = arith.mulf %200, %59 : vector<2x256xf32>
    %202 = arith.addf %197, %201 : vector<2x256xf32>
    %c23 = arith.constant 23 : index
    %c0_93 = arith.constant 0 : index
    %c0_94 = arith.constant 0 : index
    %203 = vector.load %arg4[%c23, %c0_93, %c0_94] : memref<49x2x1xf32, #tpu.memory_space<vmem>>, vector<1x2x1xf32>
    %204 = vector.shape_cast %203 : vector<1x2x1xf32> to vector<2x1xf32>
    %205 = vector.broadcast %204 : vector<2x1xf32> to vector<2x256xf32>
    %206 = arith.mulf %205, %63 : vector<2x256xf32>
    %207 = arith.addf %202, %206 : vector<2x256xf32>
    %c24 = arith.constant 24 : index
    %c0_95 = arith.constant 0 : index
    %c0_96 = arith.constant 0 : index
    %208 = vector.load %arg4[%c24, %c0_95, %c0_96] : memref<49x2x1xf32, #tpu.memory_space<vmem>>, vector<1x2x1xf32>
    %209 = vector.shape_cast %208 : vector<1x2x1xf32> to vector<2x1xf32>
    %210 = vector.broadcast %209 : vector<2x1xf32> to vector<2x256xf32>
    %211 = arith.mulf %210, %51 : vector<2x256xf32>
    %212 = arith.addf %207, %211 : vector<2x256xf32>
    %c25 = arith.constant 25 : index
    %c0_97 = arith.constant 0 : index
    %c0_98 = arith.constant 0 : index
    %213 = vector.load %arg4[%c25, %c0_97, %c0_98] : memref<49x2x1xf32, #tpu.memory_space<vmem>>, vector<1x2x1xf32>
    %214 = vector.shape_cast %213 : vector<1x2x1xf32> to vector<2x1xf32>
    %215 = vector.broadcast %214 : vector<2x1xf32> to vector<2x256xf32>
    %216 = arith.mulf %215, %67 : vector<2x256xf32>
    %217 = arith.addf %212, %216 : vector<2x256xf32>
    %c26 = arith.constant 26 : index
    %c0_99 = arith.constant 0 : index
    %c0_100 = arith.constant 0 : index
    %218 = vector.load %arg4[%c26, %c0_99, %c0_100] : memref<49x2x1xf32, #tpu.memory_space<vmem>>, vector<1x2x1xf32>
    %219 = vector.shape_cast %218 : vector<1x2x1xf32> to vector<2x1xf32>
    %220 = vector.broadcast %219 : vector<2x1xf32> to vector<2x256xf32>
    %221 = arith.mulf %220, %71 : vector<2x256xf32>
    %222 = arith.addf %217, %221 : vector<2x256xf32>
    %c27 = arith.constant 27 : index
    %c0_101 = arith.constant 0 : index
    %c0_102 = arith.constant 0 : index
    %223 = vector.load %arg4[%c27, %c0_101, %c0_102] : memref<49x2x1xf32, #tpu.memory_space<vmem>>, vector<1x2x1xf32>
    %224 = vector.shape_cast %223 : vector<1x2x1xf32> to vector<2x1xf32>
    %225 = vector.broadcast %224 : vector<2x1xf32> to vector<2x256xf32>
    %226 = arith.mulf %225, %75 : vector<2x256xf32>
    %227 = arith.addf %222, %226 : vector<2x256xf32>
    %c3_103 = arith.constant 3 : index
    %c0_104 = arith.constant 0 : index
    %c0_105 = arith.constant 0 : index
    %228 = vector.load %arg6[%c3_103, %c0_104, %c0_105] : memref<7x2x256xf32, #tpu.memory_space<vmem>>, vector<1x2x256xf32>
    %229 = vector.shape_cast %228 : vector<1x2x256xf32> to vector<2x256xf32>
    %230 = arith.mulf %229, %227 : vector<2x256xf32>
    %231 = arith.addf %193, %230 : vector<2x256xf32>
    %c28 = arith.constant 28 : index
    %c0_106 = arith.constant 0 : index
    %c0_107 = arith.constant 0 : index
    %232 = vector.load %arg4[%c28, %c0_106, %c0_107] : memref<49x2x1xf32, #tpu.memory_space<vmem>>, vector<1x2x1xf32>
    %233 = vector.shape_cast %232 : vector<1x2x1xf32> to vector<2x1xf32>
    %234 = vector.broadcast %233 : vector<2x1xf32> to vector<2x256xf32>
    %235 = arith.mulf %234, %55 : vector<2x256xf32>
    %c29 = arith.constant 29 : index
    %c0_108 = arith.constant 0 : index
    %c0_109 = arith.constant 0 : index
    %236 = vector.load %arg4[%c29, %c0_108, %c0_109] : memref<49x2x1xf32, #tpu.memory_space<vmem>>, vector<1x2x1xf32>
    %237 = vector.shape_cast %236 : vector<1x2x1xf32> to vector<2x1xf32>
    %238 = vector.broadcast %237 : vector<2x1xf32> to vector<2x256xf32>
    %239 = arith.mulf %238, %59 : vector<2x256xf32>
    %240 = arith.addf %235, %239 : vector<2x256xf32>
    %c30 = arith.constant 30 : index
    %c0_110 = arith.constant 0 : index
    %c0_111 = arith.constant 0 : index
    %241 = vector.load %arg4[%c30, %c0_110, %c0_111] : memref<49x2x1xf32, #tpu.memory_space<vmem>>, vector<1x2x1xf32>
    %242 = vector.shape_cast %241 : vector<1x2x1xf32> to vector<2x1xf32>
    %243 = vector.broadcast %242 : vector<2x1xf32> to vector<2x256xf32>
    %244 = arith.mulf %243, %63 : vector<2x256xf32>
    %245 = arith.addf %240, %244 : vector<2x256xf32>
    %c31 = arith.constant 31 : index
    %c0_112 = arith.constant 0 : index
    %c0_113 = arith.constant 0 : index
    %246 = vector.load %arg4[%c31, %c0_112, %c0_113] : memref<49x2x1xf32, #tpu.memory_space<vmem>>, vector<1x2x1xf32>
    %247 = vector.shape_cast %246 : vector<1x2x1xf32> to vector<2x1xf32>
    %248 = vector.broadcast %247 : vector<2x1xf32> to vector<2x256xf32>
    %249 = arith.mulf %248, %51 : vector<2x256xf32>
    %250 = arith.addf %245, %249 : vector<2x256xf32>
    %c32 = arith.constant 32 : index
    %c0_114 = arith.constant 0 : index
    %c0_115 = arith.constant 0 : index
    %251 = vector.load %arg4[%c32, %c0_114, %c0_115] : memref<49x2x1xf32, #tpu.memory_space<vmem>>, vector<1x2x1xf32>
    %252 = vector.shape_cast %251 : vector<1x2x1xf32> to vector<2x1xf32>
    %253 = vector.broadcast %252 : vector<2x1xf32> to vector<2x256xf32>
    %254 = arith.mulf %253, %67 : vector<2x256xf32>
    %255 = arith.addf %250, %254 : vector<2x256xf32>
    %c33 = arith.constant 33 : index
    %c0_116 = arith.constant 0 : index
    %c0_117 = arith.constant 0 : index
    %256 = vector.load %arg4[%c33, %c0_116, %c0_117] : memref<49x2x1xf32, #tpu.memory_space<vmem>>, vector<1x2x1xf32>
    %257 = vector.shape_cast %256 : vector<1x2x1xf32> to vector<2x1xf32>
    %258 = vector.broadcast %257 : vector<2x1xf32> to vector<2x256xf32>
    %259 = arith.mulf %258, %71 : vector<2x256xf32>
    %260 = arith.addf %255, %259 : vector<2x256xf32>
    %c34 = arith.constant 34 : index
    %c0_118 = arith.constant 0 : index
    %c0_119 = arith.constant 0 : index
    %261 = vector.load %arg4[%c34, %c0_118, %c0_119] : memref<49x2x1xf32, #tpu.memory_space<vmem>>, vector<1x2x1xf32>
    %262 = vector.shape_cast %261 : vector<1x2x1xf32> to vector<2x1xf32>
    %263 = vector.broadcast %262 : vector<2x1xf32> to vector<2x256xf32>
    %264 = arith.mulf %263, %75 : vector<2x256xf32>
    %265 = arith.addf %260, %264 : vector<2x256xf32>
    %c4_120 = arith.constant 4 : index
    %c0_121 = arith.constant 0 : index
    %c0_122 = arith.constant 0 : index
    %266 = vector.load %arg6[%c4_120, %c0_121, %c0_122] : memref<7x2x256xf32, #tpu.memory_space<vmem>>, vector<1x2x256xf32>
    %267 = vector.shape_cast %266 : vector<1x2x256xf32> to vector<2x256xf32>
    %c240_i32 = arith.constant 240 : i32
    %268 = tpu.dynamic_rotate %265 by %c240_i32 dim 1 : vector<2x256xf32>, i32 -> vector<2x256xf32>
    %269 = arith.mulf %267, %268 : vector<2x256xf32>
    %270 = arith.addf %231, %269 : vector<2x256xf32>
    %c35 = arith.constant 35 : index
    %c0_123 = arith.constant 0 : index
    %c0_124 = arith.constant 0 : index
    %271 = vector.load %arg4[%c35, %c0_123, %c0_124] : memref<49x2x1xf32, #tpu.memory_space<vmem>>, vector<1x2x1xf32>
    %272 = vector.shape_cast %271 : vector<1x2x1xf32> to vector<2x1xf32>
    %273 = vector.broadcast %272 : vector<2x1xf32> to vector<2x256xf32>
    %274 = arith.mulf %273, %55 : vector<2x256xf32>
    %c36 = arith.constant 36 : index
    %c0_125 = arith.constant 0 : index
    %c0_126 = arith.constant 0 : index
    %275 = vector.load %arg4[%c36, %c0_125, %c0_126] : memref<49x2x1xf32, #tpu.memory_space<vmem>>, vector<1x2x1xf32>
    %276 = vector.shape_cast %275 : vector<1x2x1xf32> to vector<2x1xf32>
    %277 = vector.broadcast %276 : vector<2x1xf32> to vector<2x256xf32>
    %278 = arith.mulf %277, %59 : vector<2x256xf32>
    %279 = arith.addf %274, %278 : vector<2x256xf32>
    %c37 = arith.constant 37 : index
    %c0_127 = arith.constant 0 : index
    %c0_128 = arith.constant 0 : index
    %280 = vector.load %arg4[%c37, %c0_127, %c0_128] : memref<49x2x1xf32, #tpu.memory_space<vmem>>, vector<1x2x1xf32>
    %281 = vector.shape_cast %280 : vector<1x2x1xf32> to vector<2x1xf32>
    %282 = vector.broadcast %281 : vector<2x1xf32> to vector<2x256xf32>
    %283 = arith.mulf %282, %63 : vector<2x256xf32>
    %284 = arith.addf %279, %283 : vector<2x256xf32>
    %c38 = arith.constant 38 : index
    %c0_129 = arith.constant 0 : index
    %c0_130 = arith.constant 0 : index
    %285 = vector.load %arg4[%c38, %c0_129, %c0_130] : memref<49x2x1xf32, #tpu.memory_space<vmem>>, vector<1x2x1xf32>
    %286 = vector.shape_cast %285 : vector<1x2x1xf32> to vector<2x1xf32>
    %287 = vector.broadcast %286 : vector<2x1xf32> to vector<2x256xf32>
    %288 = arith.mulf %287, %51 : vector<2x256xf32>
    %289 = arith.addf %284, %288 : vector<2x256xf32>
    %c39 = arith.constant 39 : index
    %c0_131 = arith.constant 0 : index
    %c0_132 = arith.constant 0 : index
    %290 = vector.load %arg4[%c39, %c0_131, %c0_132] : memref<49x2x1xf32, #tpu.memory_space<vmem>>, vector<1x2x1xf32>
    %291 = vector.shape_cast %290 : vector<1x2x1xf32> to vector<2x1xf32>
    %292 = vector.broadcast %291 : vector<2x1xf32> to vector<2x256xf32>
    %293 = arith.mulf %292, %67 : vector<2x256xf32>
    %294 = arith.addf %289, %293 : vector<2x256xf32>
    %c40 = arith.constant 40 : index
    %c0_133 = arith.constant 0 : index
    %c0_134 = arith.constant 0 : index
    %295 = vector.load %arg4[%c40, %c0_133, %c0_134] : memref<49x2x1xf32, #tpu.memory_space<vmem>>, vector<1x2x1xf32>
    %296 = vector.shape_cast %295 : vector<1x2x1xf32> to vector<2x1xf32>
    %297 = vector.broadcast %296 : vector<2x1xf32> to vector<2x256xf32>
    %298 = arith.mulf %297, %71 : vector<2x256xf32>
    %299 = arith.addf %294, %298 : vector<2x256xf32>
    %c41 = arith.constant 41 : index
    %c0_135 = arith.constant 0 : index
    %c0_136 = arith.constant 0 : index
    %300 = vector.load %arg4[%c41, %c0_135, %c0_136] : memref<49x2x1xf32, #tpu.memory_space<vmem>>, vector<1x2x1xf32>
    %301 = vector.shape_cast %300 : vector<1x2x1xf32> to vector<2x1xf32>
    %302 = vector.broadcast %301 : vector<2x1xf32> to vector<2x256xf32>
    %303 = arith.mulf %302, %75 : vector<2x256xf32>
    %304 = arith.addf %299, %303 : vector<2x256xf32>
    %c5_137 = arith.constant 5 : index
    %c0_138 = arith.constant 0 : index
    %c0_139 = arith.constant 0 : index
    %305 = vector.load %arg6[%c5_137, %c0_138, %c0_139] : memref<7x2x256xf32, #tpu.memory_space<vmem>>, vector<1x2x256xf32>
    %306 = vector.shape_cast %305 : vector<1x2x256xf32> to vector<2x256xf32>
    %c224_i32 = arith.constant 224 : i32
    %307 = tpu.dynamic_rotate %304 by %c224_i32 dim 1 : vector<2x256xf32>, i32 -> vector<2x256xf32>
    %308 = arith.mulf %306, %307 : vector<2x256xf32>
    %309 = arith.addf %270, %308 : vector<2x256xf32>
    %c42 = arith.constant 42 : index
    %c0_140 = arith.constant 0 : index
    %c0_141 = arith.constant 0 : index
    %310 = vector.load %arg4[%c42, %c0_140, %c0_141] : memref<49x2x1xf32, #tpu.memory_space<vmem>>, vector<1x2x1xf32>
    %311 = vector.shape_cast %310 : vector<1x2x1xf32> to vector<2x1xf32>
    %312 = vector.broadcast %311 : vector<2x1xf32> to vector<2x256xf32>
    %313 = arith.mulf %312, %55 : vector<2x256xf32>
    %c43 = arith.constant 43 : index
    %c0_142 = arith.constant 0 : index
    %c0_143 = arith.constant 0 : index
    %314 = vector.load %arg4[%c43, %c0_142, %c0_143] : memref<49x2x1xf32, #tpu.memory_space<vmem>>, vector<1x2x1xf32>
    %315 = vector.shape_cast %314 : vector<1x2x1xf32> to vector<2x1xf32>
    %316 = vector.broadcast %315 : vector<2x1xf32> to vector<2x256xf32>
    %317 = arith.mulf %316, %59 : vector<2x256xf32>
    %318 = arith.addf %313, %317 : vector<2x256xf32>
    %c44 = arith.constant 44 : index
    %c0_144 = arith.constant 0 : index
    %c0_145 = arith.constant 0 : index
    %319 = vector.load %arg4[%c44, %c0_144, %c0_145] : memref<49x2x1xf32, #tpu.memory_space<vmem>>, vector<1x2x1xf32>
    %320 = vector.shape_cast %319 : vector<1x2x1xf32> to vector<2x1xf32>
    %321 = vector.broadcast %320 : vector<2x1xf32> to vector<2x256xf32>
    %322 = arith.mulf %321, %63 : vector<2x256xf32>
    %323 = arith.addf %318, %322 : vector<2x256xf32>
    %c45 = arith.constant 45 : index
    %c0_146 = arith.constant 0 : index
    %c0_147 = arith.constant 0 : index
    %324 = vector.load %arg4[%c45, %c0_146, %c0_147] : memref<49x2x1xf32, #tpu.memory_space<vmem>>, vector<1x2x1xf32>
    %325 = vector.shape_cast %324 : vector<1x2x1xf32> to vector<2x1xf32>
    %326 = vector.broadcast %325 : vector<2x1xf32> to vector<2x256xf32>
    %327 = arith.mulf %326, %51 : vector<2x256xf32>
    %328 = arith.addf %323, %327 : vector<2x256xf32>
    %c46 = arith.constant 46 : index
    %c0_148 = arith.constant 0 : index
    %c0_149 = arith.constant 0 : index
    %329 = vector.load %arg4[%c46, %c0_148, %c0_149] : memref<49x2x1xf32, #tpu.memory_space<vmem>>, vector<1x2x1xf32>
    %330 = vector.shape_cast %329 : vector<1x2x1xf32> to vector<2x1xf32>
    %331 = vector.broadcast %330 : vector<2x1xf32> to vector<2x256xf32>
    %332 = arith.mulf %331, %67 : vector<2x256xf32>
    %333 = arith.addf %328, %332 : vector<2x256xf32>
    %c47 = arith.constant 47 : index
    %c0_150 = arith.constant 0 : index
    %c0_151 = arith.constant 0 : index
    %334 = vector.load %arg4[%c47, %c0_150, %c0_151] : memref<49x2x1xf32, #tpu.memory_space<vmem>>, vector<1x2x1xf32>
    %335 = vector.shape_cast %334 : vector<1x2x1xf32> to vector<2x1xf32>
    %336 = vector.broadcast %335 : vector<2x1xf32> to vector<2x256xf32>
    %337 = arith.mulf %336, %71 : vector<2x256xf32>
    %338 = arith.addf %333, %337 : vector<2x256xf32>
    %c48 = arith.constant 48 : index
    %c0_152 = arith.constant 0 : index
    %c0_153 = arith.constant 0 : index
    %339 = vector.load %arg4[%c48, %c0_152, %c0_153] : memref<49x2x1xf32, #tpu.memory_space<vmem>>, vector<1x2x1xf32>
    %340 = vector.shape_cast %339 : vector<1x2x1xf32> to vector<2x1xf32>
    %341 = vector.broadcast %340 : vector<2x1xf32> to vector<2x256xf32>
    %342 = arith.mulf %341, %75 : vector<2x256xf32>
    %343 = arith.addf %338, %342 : vector<2x256xf32>
    %c6_154 = arith.constant 6 : index
    %c0_155 = arith.constant 0 : index
    %c0_156 = arith.constant 0 : index
    %344 = vector.load %arg6[%c6_154, %c0_155, %c0_156] : memref<7x2x256xf32, #tpu.memory_space<vmem>>, vector<1x2x256xf32>
    %345 = vector.shape_cast %344 : vector<1x2x256xf32> to vector<2x256xf32>
    %c208_i32 = arith.constant 208 : i32
    %346 = tpu.dynamic_rotate %343 by %c208_i32 dim 1 : vector<2x256xf32>, i32 -> vector<2x256xf32>
    %347 = arith.mulf %345, %346 : vector<2x256xf32>
    %348 = arith.addf %309, %347 : vector<2x256xf32>
    %cst_157 = arith.constant dense<0.000000e+00> : vector<256xf32>
    %349 = vector.multi_reduction <add>, %348, %cst_157 [0] : vector<2x256xf32> to vector<256xf32>
    %350 = vector.shape_cast %349 : vector<256xf32> to vector<1x256xf32>
    %351 = arith.negf %350 : vector<1x256xf32>
    %352 = math.exp %351 : vector<1x256xf32>
    %cst_158 = arith.constant 1.000000e+00 : f32
    %353 = vector.broadcast %cst_158 : f32 to vector<1x256xf32>
    %354 = arith.addf %353, %352 : vector<1x256xf32>
    %355 = arith.divf %353, %354 : vector<1x256xf32>
    %356 = vector.broadcast %355 : vector<1x256xf32> to vector<32x256xf32>
    %357 = arith.mulf %37, %356 : vector<32x256xf32>
    %c0_159 = arith.constant 0 : index
    %c0_160 = arith.constant 0 : index
    %c0_161 = arith.constant 0 : index
    %358 = vector.load %arg7[%c0_159, %c0_160, %c0_161] : memref<1x32x256xf32, #tpu.memory_space<vmem>>, vector<1x32x256xf32>
    %359 = vector.shape_cast %358 : vector<1x32x256xf32> to vector<32x256xf32>
    %360 = vector.shape_cast %357 : vector<32x256xf32> to vector<1x32x256xf32>
    tpu.vector_store %arg7[%c0_159, %c0_160, %c0_161], %360 {strides = array<i32>} : memref<1x32x256xf32, #tpu.memory_space<vmem>>, vector<1x32x256xf32>,
    return
  }
  func.func @transform_0(%arg0: i32) -> (i32, i32, i32) {
    %c0_i32 = arith.constant 0 : i32
    %c0_i32_0 = arith.constant 0 : i32
    %c0_i32_1 = arith.constant 0 : i32
    return %arg0, %c0_i32, %c0_i32_0 : i32, i32, i32
  }
  func.func @transform_1(%arg0: i32) -> (i32, i32) {
    %c0_i32 = arith.constant 0 : i32
    %c0_i32_0 = arith.constant 0 : i32
    %c0_i32_1 = arith.constant 0 : i32
    return %c0_i32, %c0_i32_0 : i32, i32
  }
  func.func @transform_2(%arg0: i32) -> (i32, i32) {
    %c0_i32 = arith.constant 0 : i32
    %c0_i32_0 = arith.constant 0 : i32
    %c0_i32_1 = arith.constant 0 : i32
    return %c0_i32, %c0_i32_0 : i32, i32
  }
  func.func @transform_3(%arg0: i32) -> (i32, i32, i32) {
    %c0_i32 = arith.constant 0 : i32
    %c0_i32_0 = arith.constant 0 : i32
    %c0_i32_1 = arith.constant 0 : i32
    %c0_i32_2 = arith.constant 0 : i32
    return %c0_i32, %c0_i32_0, %c0_i32_1 : i32, i32, i32
  }
  func.func @transform_4(%arg0: i32) -> (i32, i32, i32) {
    %c0_i32 = arith.constant 0 : i32
    %c0_i32_0 = arith.constant 0 : i32
    %c0_i32_1 = arith.constant 0 : i32
    %c0_i32_2 = arith.constant 0 : i32
    return %c0_i32, %c0_i32_0, %c0_i32_1 : i32, i32, i32
  }
  func.func @transform_5(%arg0: i32) -> (i32, i32, i32) {
    %c0_i32 = arith.constant 0 : i32
    %c0_i32_0 = arith.constant 0 : i32
    %c0_i32_1 = arith.constant 0 : i32
    %c0_i32_2 = arith.constant 0 : i32
    return %c0_i32, %c0_i32_0, %c0_i32_1 : i32, i32, i32
  }
  func.func @transform_6(%arg0: i32) -> (i32, i32, i32) {
    %c0_i32 = arith.constant 0 : i32
    %c0_i32_0 = arith.constant 0 : i32
    %c0_i32_1 = arith.constant 0 : i32
    return %arg0, %c0_i32, %c0_i32_0 : i32, i32, i32
  }
}

</mosaic_0001>

<bundles_post_ra>
// kernel: cbam_forward.1
= control target key start
LH: loop header
LB: loop body
LE: loop exit
PB: predicated region body
PF: predicated region fallthrough
CT: control target
= control target key end

     0   :  { %s1601_s21 = smov 0   ;;  %s2350_s0 = inlined_call_operand.vmem [shape: f32[2,32,256], index: 0, kind: input, shape index: {}]   ;;  %s2351_s1 = inlined_call_operand.vmem [shape: f32[32,2], index: 1, kind: input, shape index: {}]   ;;  %s2352_s2 = inlined_call_operand.vmem [shape: f32[32,2], index: 2, kind: input, shape index: {}]   ;;  %s2353_s3 = inlined_call_operand.vmem [shape: f32[49,2,1], index: 3, kind: input, shape index: {}]   ;;  %s2354_s4 = inlined_call_operand.vmem [shape: f32[7,2,256], index: 4, kind: input, shape index: {}]   ;;  %s2355_s5 = inlined_call_operand.vmem [shape: f32[7,2,256], index: 5, kind: input, shape index: {}]   ;;  %s2356_s6 = inlined_call_operand.vmem [shape: f32[2,32,256], index: 6, kind: output, shape index: {}]  }
   0x1 LB: > { %s1418_s22 = sadd.s32 4294967295, %s1550_s21   ;;  %p1422_p0 = scmp.ge.s32.totalorder %s1550_s21, 1  ;;  %s1550_s21 = sphi %s1601_s21, %s16_s21  }
   0x2   : > { %p212_p1 = scmp.lt.s32.totalorder %s1550_s21, 3 }
   0x4   : > { %p213_p2 = pnand %p1422_p0, %p212_p1 }
   0x6   : > { %216 = sbr.rel (%p213_p2) target bundleno = 760 (0x2f8), region = 44 }
   0xd   : > { %p242_p3 = scmp.lt.s32.totalorder %s1418_s22, 1  ;;  %v1552_v16 = vmov 0   ;;  %v290_v19 = vld [vmem:[%s2351_s1 + $0x8] sm:$0xff]  ;;  %v289_v20 = vld [vmem:[%s2351_s1] sm:$0xff]  ;;  %v291_v26 = vld [vmem:[%s2351_s1 + $0x10] sm:$0xff]  ;;  %vm301_vm0 = vcmask 15360  }
   0xe   : > { %1518 = vset.pattern.permute.xlu0 %v1552_v16  ;;  %1519 = vset.pattern.permute.xlu1 %v1552_v16  ;;  %v292_v35 = vld [vmem:[%s2351_s1 + $0x18] sm:$0xff]  ;;  %s1553_s29 = smov 3   ;;  %s1554_s30 = smov 2   ;;  %vm1320_vm14 = vcmask 1041408  }
   0xf   : > { %s2409_s22 = smov (!%p242_p3, %s1418_s22), 1  ;;  %s1555_s7 = smov 1  }
  0x10   : > { %s1494_s23 = sshll.u32 %s2409_s22, 6  ;;  %s1556_s8 = smov 127  }
  0x11   : > { %s246_s26 = scalar_lea.vmem %s2350_s0, %s1494_s23  ;;  %s1557_s9 = smov 126  }
  0x12   : > { %v1617_v0 = vld [vmem:[%s246_s26] sm:$0xff]  ;;  %v1619_v1 = vld [vmem:[%s246_s26 + $0x8] sm:$0xff]  ;;  %v1621_v2 = vld [vmem:[%s246_s26 + $0x10] sm:$0xff]  ;;  %s1558_s10 = smov 125   ;;  %s1562_s11 = smov 16  }
  0x13   : > { %v272_v3 = vadd.f32 %v1619_v1, %v1617_v0  ;;  %v260_v4 = vmax.f32 %v1617_v0, %v1619_v1  ;;  %v1627_v5 = vld [vmem:[%s246_s26 + $0x18] sm:$0xff]  ;;  %v1633_v8 = vld [vmem:[%s246_s26 + $0x20] sm:$0xff]  ;;  %v1635_v9 = vld [vmem:[%s246_s26 + $0x28] sm:$0xff]  ;;  %s1563_s12 = smov 112   ;;  %s1564_s13 = smov 96  }
  0x14   : > { %v275_v6 = vadd.f32 %v1627_v5, %v1621_v2  ;;  %v263_v7 = vmax.f32 %v1621_v2, %v1627_v5  ;;  %v278_v10 = vadd.f32 %v1635_v9, %v1633_v8  ;;  %v266_v11 = vmax.f32 %v1633_v8, %v1635_v9  ;;  %v1641_v12 = vld [vmem:[%s246_s26 + $0x30] sm:$0xff]  ;;  %v1643_v13 = vld [vmem:[%s246_s26 + $0x38] sm:$0xff]  ;;  %s1565_s14 = smov 80  }
  0x15   : > { %273 = vadd.xlane.f32.xlu0 %v272_v3  ;;  %261 = vmax.xlane.f32.xlu1 %v260_v4  ;;  %v281_v14 = vadd.f32 %v1643_v13, %v1641_v12  ;;  %v269_v15 = vmax.f32 %v1641_v12, %v1643_v13 }
  0x19   : > { %276 = vadd.xlane.f32.xlu0 %v275_v6  ;;  %264 = vmax.xlane.f32.xlu1 %v263_v7  ;;  %v294_v6 = vld [vmem:[%s2352_s2 + $0x8] sm:$0xff]  ;;  %v293_v7 = vld [vmem:[%s2352_s2] sm:$0xff] }
  0x1d   : > { %279 = vadd.xlane.f32.xlu0 %v278_v10  ;;  %267 = vmax.xlane.f32.xlu1 %v266_v11 }
  0x21   : > { %282 = vadd.xlane.f32.xlu0 %v281_v14  ;;  %270 = vmax.xlane.f32.xlu1 %v269_v15  ;;  %v295_v14 = vld [vmem:[%s2352_s2 + $0x10] sm:$0xff] }
  0xa2   : > { %v274_v17 = vpop.xlane.xlu0 %273  ;;  %v262_v18 = vpop.xlane.xlu1 %261 }
  0xa3   : > { %v285_v23 = vmul.f32 0.00390625, %v274_v17  ;;  %v297_v27 = vmul.f32 %v289_v20, %v262_v18 }
  0xa5   : > { %v332_v31 = vmul.f32 %v289_v20, %v285_v23  ;;  %v302_v36 = vsel %vm301_vm0, %v297_v27, 0.0 }
  0xa6   : > { %v277_v21 = vpop.xlane.xlu0 %276  ;;  %v265_v22 = vpop.xlane.xlu1 %264 }
  0xa7   : > { %v286_v24 = vmul.f32 0.00390625, %v277_v21  ;;  %v298_v25 = vmul.f32 %v290_v19, %v265_v22  ;;  %v336_v43 = vsel %vm301_vm0, %v332_v31, 0.0 }
  0xa9   : > { %v333_v28 = vmul.f32 %v290_v19, %v286_v24  ;;  %v303_v32 = vsel %vm301_vm0, %v298_v25, 0.0 }
  0xaa   : > { %v280_v29 = vpop.xlane.xlu0 %279  ;;  %v268_v30 = vpop.xlane.xlu1 %267  ;;  %v304_v40 = vadd.f32 %v303_v32, %v302_v36  ;;  %v1439_v36 = vld [vmem:[%s2353_s3 + $0x8] sm:$0x3] }
  0xab   : > { %v287_v33 = vmul.f32 0.00390625, %v280_v29  ;;  %v299_v34 = vmul.f32 %v291_v26, %v268_v30  ;;  %v337_v37 = vsel %vm301_vm0, %v333_v28, 0.0 }
  0xac   : > { %v338_v47 = vadd.f32 %v337_v37, %v336_v43  ;;  %v1438_v37 = vld [vmem:[%s2353_s3 + $0x6] sm:$0x3]  ;;  %v1451_v43 = vld [vmem:[%s2353_s3 + $0x1e] sm:$0x3] }
  0xad   : > { %v334_v38 = vmul.f32 %v291_v26, %v287_v33  ;;  %v305_v39 = vsel %vm301_vm0, %v299_v34, 0.0  ;;  %v296_v26 = vld [vmem:[%s2352_s2 + $0x18] sm:$0xff]  ;;  %v1436_v33 = vld [vmem:[%s2353_s3 + $0x2] sm:$0x3]  ;;  %v1437_v34 = vld [vmem:[%s2353_s3 + $0x4] sm:$0x3] }
  0xae   : > { %v283_v41 = vpop.xlane.xlu0 %282  ;;  %v271_v42 = vpop.xlane.xlu1 %270  ;;  %v306_v48 = vadd.f32 %v305_v39, %v304_v40  ;;  %v1442_v39 = vld [vmem:[%s2353_s3 + $0xe] sm:$0x3]  ;;  %v1450_v40 = vld [vmem:[%s2353_s3 + $0x1c] sm:$0x3] }
  0xaf   : > { %v339_v44 = vsel %vm301_vm0, %v334_v38, 0.0  ;;  %v288_v45 = vmul.f32 0.00390625, %v283_v41  ;;  %v300_v46 = vmul.f32 %v292_v35, %v271_v42  ;;  %v1443_v38 = vld [vmem:[%s2353_s3 + $0x10] sm:$0x3]  ;;  %v1444_v41 = vld [vmem:[%s2353_s3 + $0x12] sm:$0x3] }
  0xb0   : > { %v340_v51 = vadd.f32 %v339_v44, %v338_v47  ;;  %v1445_v42 = vld [vmem:[%s2353_s3 + $0x14] sm:$0x3]  ;;  %v1446_v44 = vld [vmem:[%s2353_s3 + $0x16] sm:$0x3]  ;;  %v1453_v47 = vld [vmem:[%s2353_s3 + $0x22] sm:$0x3] }
  0xb1   : > { %v335_v49 = vmul.f32 %v292_v35, %v288_v45  ;;  %v307_v50 = vsel %vm301_vm0, %v300_v46, 0.0  ;;  %v573_v35 = vld [vmem:[%s2353_s3] sm:$0x3]  ;;  %v1466_v46 = vld [vmem:[%s2353_s3 + $0x38] sm:$0x3] }
  0xb2   : > { %v308_v52 = vadd.f32 %v307_v50, %v306_v48  ;;  %v1452_v45 = vld [vmem:[%s2353_s3 + $0x20] sm:$0x3]  ;;  %v1440_v48 = vld [vmem:[%s2353_s3 + $0xa] sm:$0x3]  ;;  %v1454_v50 = vld [vmem:[%s2353_s3 + $0x24] sm:$0x3] }
  0xb3   : > { %v341_v53 = vsel %vm301_vm0, %v335_v49, 0.0  ;;  %v1467_v49 = vld [vmem:[%s2353_s3 + $0x3a] sm:$0x3] }
  0xb4   : > { %v342_v54 = vadd.f32 %v341_v53, %v340_v51  ;;  %v309_v55 = vrot.slane %v308_v52, 4  ;;  %v1447_v51 = vld [vmem:[%s2353_s3 + $0x18] sm:$0x3]  ;;  %v1468_v53 = vld [vmem:[%s2353_s3 + $0x3c] sm:$0x3] }
  0xb6   : > { %v343_v56 = vrot.slane %v342_v54, 4  ;;  %v310_v57 = vadd.f32 %v309_v55, %v308_v52  ;;  %v1474_v52 = vld [vmem:[%s2353_s3 + $0x46] sm:$0x3]  ;;  %v1475_v55 = vld [vmem:[%s2353_s3 + $0x48] sm:$0x3] }
  0xb8   : > { %v344_v58 = vadd.f32 %v343_v56, %v342_v54  ;;  %v311_v59 = vrot.slane %v310_v57, 2  ;;  %v1441_v54 = vld [vmem:[%s2353_s3 + $0xc] sm:$0x3]  ;;  %v1455_v56 = vld [vmem:[%s2353_s3 + $0x26] sm:$0x3] }
  0xba   : > { %v345_v60 = vrot.slane %v344_v58, 2  ;;  %v312_v61 = vadd.f32 %v311_v59, %v310_v57  ;;  %v1448_v57 = vld [vmem:[%s2353_s3 + $0x1a] sm:$0x3]  ;;  %v1469_v59 = vld [vmem:[%s2353_s3 + $0x3e] sm:$0x3] }
  0xbc   : > { %v346_v62 = vadd.f32 %v345_v60, %v344_v58  ;;  %v313_v63 = vrot.slane %v312_v61, 1  ;;  %v1476_v58 = vld [vmem:[%s2353_s3 + $0x4a] sm:$0x3]  ;;  %v1483_v60 = vld [vmem:[%s2353_s3 + $0x56] sm:$0x3] }
  0xbe   : > { %v347_v3 = vrot.slane %v346_v62, 1  ;;  %v314_v4 = vadd.f32 %v313_v63, %v312_v61  ;;  %v1482_v61 = vld [vmem:[%s2353_s3 + $0x54] sm:$0x3]  ;;  %v1456_v63 = vld [vmem:[%s2353_s3 + $0x28] sm:$0x3] }
  0xc0   : > { %v315_v10 = vmax.f32 %v314_v4, 0.0  ;;  %v348_v11 = vadd.f32 %v347_v3, %v346_v62  ;;  %v1470_v62 = vld [vmem:[%s2353_s3 + $0x40] sm:$0x3]  ;;  %v1484_v3 = vld [vmem:[%s2353_s3 + $0x58] sm:$0x3] }
  0xc1   : > { %v1477_v4 = vld [vmem:[%s2353_s3 + $0x4c] sm:$0x3] }
  0xc2   : > { %v317_v15 = vmul.f32 %v315_v10, %v294_v6  ;;  %v316_v16 = vmul.f32 %v315_v10, %v293_v7  ;;  %v349_v17 = vmax.f32 %v348_v11, 0.0  ;;  %v318_v21 = vmul.f32 %v315_v10, %v295_v14 }
  0xc3   : > { %v319_v30 = vmul.f32 %v315_v10, %v296_v26 }
  0xc4   : > { %v323_v18 = vsel %vm301_vm0, %v317_v15, 0.0  ;;  %v320_v19 = vsel %vm301_vm0, %v316_v16, 0.0  ;;  %v351_v20 = vmul.f32 %v349_v17, %v294_v6  ;;  %v326_v23 = vsel %vm301_vm0, %v318_v21, 0.0  ;;  %v1478_v6 = vld [vmem:[%s2353_s3 + $0x4e] sm:$0x3] }
  0xc5   : > { %324 = vadd.xlane.f32.xlu1 %v323_v18  ;;  %321 = vadd.xlane.f32.xlu0 %v320_v19  ;;  %v352_v24 = vmul.f32 %v349_v17, %v295_v14  ;;  %v350_v25 = vmul.f32 %v349_v17, %v293_v7  ;;  %v353_v29 = vmul.f32 %v349_v17, %v296_v26  ;;  %v329_v32 = vsel %vm301_vm0, %v319_v30, 0.0  ;;  %v1471_v7 = vld [vmem:[%s2353_s3 + $0x42] sm:$0x3] }
  0xc6   : > { %v357_v22 = vsel %vm301_vm0, %v351_v20, 0.0 }
  0xc7   : > { %v360_v27 = vsel %vm301_vm0, %v352_v24, 0.0  ;;  %v354_v28 = vsel %vm301_vm0, %v350_v25, 0.0  ;;  %v363_v31 = vsel %vm301_vm0, %v353_v29, 0.0 }
  0xc9   : > { %358 = vadd.xlane.f32.xlu1 %v357_v22  ;;  %327 = vadd.xlane.f32.xlu0 %v326_v23 }
  0xcd   : > { %361 = vadd.xlane.f32.xlu1 %v360_v27  ;;  %355 = vadd.xlane.f32.xlu0 %v354_v28 }
  0xd1   : > { %364 = vadd.xlane.f32.xlu1 %v363_v31  ;;  %330 = vadd.xlane.f32.xlu0 %v329_v32 }
  0xe2   : > { %596 = vperm.xlu1 %1519, %v1436_v33  }
  0xe6   : > { %618 = vperm.xlu1 %1519, %v1437_v34  }
  0xe7   : > { %576 = vperm.xlu0 %1518, %v573_v35  }
  0xea   : > { %651 = vperm.xlu1 %1519, %v1439_v36  }
  0xeb   : > { %640 = vperm.xlu0 %1518, %v1438_v37  }
  0xee   : > { %747 = vperm.xlu1 %1519, %v1443_v38  }
  0xef   : > { %738 = vperm.xlu0 %1518, %v1442_v39  }
  0xf2   : > { %835 = vperm.xlu1 %1519, %v1450_v40  }
  0xf3   : > { %758 = vperm.xlu0 %1518, %v1444_v41  }
  0xf6   : > { %769 = vperm.xlu1 %1519, %v1445_v42  }
  0xf7   : > { %844 = vperm.xlu0 %1518, %v1451_v43  }
  0xfa   : > { %780 = vperm.xlu1 %1519, %v1446_v44  }
  0xfb   : > { %855 = vperm.xlu0 %1518, %v1452_v45  }
  0xfe   : > { %1022 = vperm.xlu1 %1519, %v1466_v46  }
  0xff   : > { %866 = vperm.xlu0 %1518, %v1453_v47  }
 0x102   : > { %673 = vperm.xlu1 %1519, %v1440_v48  }
 0x103   : > { %1031 = vperm.xlu0 %1518, %v1467_v49  }
 0x106   : > { %877 = vperm.xlu1 %1519, %v1454_v50  }
 0x107   : > { %791 = vperm.xlu0 %1518, %v1447_v51  }
 0x10a   : > { %1119 = vperm.xlu1 %1519, %v1474_v52  }
 0x10b   : > { %1042 = vperm.xlu0 %1518, %v1468_v53  }
 0x10e   : > { %695 = vperm.xlu1 %1519, %v1441_v54  }
 0x10f   : > { %1128 = vperm.xlu0 %1518, %v1475_v55  }
 0x112   : > { %888 = vperm.xlu1 %1519, %v1455_v56  }
 0x113   : > { %802 = vperm.xlu0 %1518, %v1448_v57  }
 0x116   : > { %1139 = vperm.xlu1 %1519, %v1476_v58   ;;  %v441_v58 = vlaneseq }
 0x117   : > { %1053 = vperm.xlu0 %1518, %v1469_v59  }
 0x11a   : > { %1225 = vperm.xlu1 %1519, %v1483_v60  }
 0x11b   : > { %1216 = vperm.xlu0 %1518, %v1482_v61  }
 0x11e   : > { %1064 = vperm.xlu1 %1519, %v1470_v62  }
 0x11f   : > { %899 = vperm.xlu0 %1518, %v1456_v63  }
 0x122   : > { %1236 = vperm.xlu1 %1519, %v1484_v3  }
 0x123   : > { %1150 = vperm.xlu0 %1518, %v1477_v4  }
 0x126   : > { %1161 = vperm.xlu1 %1519, %v1478_v6  }
 0x127   : > { %1075 = vperm.xlu0 %1518, %v1471_v7   ;;  %v1835_v7 = vshrl.u32 %v441_v58, 7 }
 0x129   : > { %vm443_vm1 = vcmp.eq.s32.totalorder %v1835_v7, 0 }
 0x152   : > { %v325_v10 = vpop.xlane.xlu1 %324  ;;  %v322_v11 = vpop.xlane.xlu0 %321 }
 0x156   : > { %v359_v14 = vpop.xlane.xlu1 %358  ;;  %v328_v15 = vpop.xlane.xlu0 %327 }
 0x157   : > { %v367_v16 = vadd.f32 %v359_v14, %v325_v10 }
 0x159   : > { %v1428_v17 = vmul.f32 -1.442695, %v367_v16 }
 0x15a   : > { %v362_v18 = vpop.xlane.xlu1 %361  ;;  %v356_v19 = vpop.xlane.xlu0 %355 }
 0x15b   : > { %1520 = vpow2.f32 %v1428_v17  ;;  %v368_v20 = vadd.f32 %v362_v18, %v328_v15  ;;  %v366_v21 = vadd.f32 %v356_v19, %v322_v11 }
 0x15d   : > { %v1429_v22 = vmul.f32 -1.442695, %v368_v20  ;;  %v1427_v23 = vmul.f32 -1.442695, %v366_v21 }
 0x15e   : > { %v365_v24 = vpop.xlane.xlu1 %364  ;;  %v331_v25 = vpop.xlane.xlu0 %330 }
 0x15f   : > { %1522 = vpow2.f32 %v1429_v22  ;;  %v369_v26 = vadd.f32 %v365_v24, %v331_v25 }
 0x160   : > { %1524 = vpow2.f32 %v1427_v23 }
 0x161   : > { %v1430_v27 = vmul.f32 -1.442695, %v369_v26 }
 0x162   : > { %v1846_v26 = vpop.permute.xlu1 %596 }
 0x163   : > { %1526 = vpow2.f32 %v1430_v27 }
 0x165   : > { %v1521_v28 = vpop.eup %1520 }
 0x166   : > { %v383_v29 = vadd.f32 1.0, %v1521_v28  ;;  %v1852_v27 = vpop.permute.xlu1 %618  ;;  %v1855_v28 = vpop.permute.xlu0 %576 }
 0x168   : > { %1528 = vrcp.f32 %v383_v29  ;;  %v1485_v29 = vld [vmem:[%s2353_s3 + $0x5a] sm:$0x3] }
 0x169   : > { %v1523_v30 = vpop.eup %1522 }
 0x16a   : > { %v1525_v31 = vpop.eup %1524  ;;  %v384_v32 = vadd.f32 1.0, %v1523_v30  ;;  %v1861_v30 = vpop.permute.xlu1 %651 }
 0x16b   : > { %v382_v33 = vadd.f32 1.0, %v1525_v31  ;;  %v1479_v31 = vld [vmem:[%s2353_s3 + $0x50] sm:$0x3] }
 0x16c   : > { %1530 = vrcp.f32 %v384_v32  ;;  %v1867_v32 = vpop.permute.xlu0 %640 }
 0x16d   : > { %v1527_v34 = vpop.eup %1526  ;;  %1532 = vrcp.f32 %v382_v33  ;;  %v1472_v33 = vld [vmem:[%s2353_s3 + $0x44] sm:$0x3] }
 0x16e   : > { %v385_v35 = vadd.f32 1.0, %v1527_v34  ;;  %v1873_v34 = vpop.permute.xlu1 %747 }
 0x170   : > { %1534 = vrcp.f32 %v385_v35  ;;  %v1480_v35 = vld [vmem:[%s2353_s3 + $0x52] sm:$0x3] }
 0x172   : > { %v1529_v36 = vpop.eup %1528 }
 0x173   : > { %v1795_v39 = vmul.f32 %v1529_v36, %v1621_v2  ;;  %v1798_v40 = vmul.f32 %v1529_v36, %v1627_v5  ;;  %v1878_v36 = vpop.permute.xlu0 %738 }
 0x175   : > { %2372 = vst [vmem:[#allocation2_spill] sm:$0xff] %v1795_v39  ;;  %2373 = vst [vmem:[#allocation3_spill] sm:$0xff] %v1798_v40 }
 0x176   : > { %v1531_v37 = vpop.eup %1530 }
 0x177   : > { %v1533_v38 = vpop.eup %1532  ;;  %v1807_v43 = vmul.f32 %v1531_v37, %v1633_v8  ;;  %v1810_v44 = vmul.f32 %v1531_v37, %v1635_v9  ;;  %v1486_v37 = vld [vmem:[%s2353_s3 + $0x5c] sm:$0x3] }
 0x178   : > { %v1801_v41 = vmul.f32 %v1533_v38, %v1617_v0  ;;  %v1804_v42 = vmul.f32 %v1533_v38, %v1619_v1  ;;  %v1488_v38 = vld [vmem:[%s2353_s3 + $0x60] sm:$0x3] }
 0x179   : > { %2376 = vst [vmem:[#allocation6_spill] sm:$0xff] %v1807_v43  ;;  %2377 = vst [vmem:[#allocation7_spill] sm:$0xff] %v1810_v44 }
 0x17a   : > { %2374 = vst [vmem:[#allocation4_spill] sm:$0xff] %v1801_v41  ;;  %2375 = vst [vmem:[#allocation5_spill] sm:$0xff] %v1804_v42  ;;  %v1535_v45 = vpop.eup %1534  ;;  %v420_v2 = vadd.f32 %v1795_v39, %v1801_v41  ;;  %v429_v5 = vadd.f32 %v1798_v40, %v1804_v42  ;;  %v402_v9 = vmax.f32 %v1801_v41, %v1807_v43 }
 0x17b   : > { %v1817_v46 = vmul.f32 %v1535_v45, %v1641_v12  ;;  %v1820_v0 = vmul.f32 %v1535_v45, %v1643_v13  ;;  %v411_v47 = vmax.f32 %v1804_v42, %v1810_v44  ;;  %v1886_v45 = vpop.permute.xlu1 %835 }
 0x17c   : > { %v421_v1 = vadd.f32 %v420_v2, %v1807_v43  ;;  %v430_v8 = vadd.f32 %v429_v5, %v1810_v44  ;;  %v1487_v2 = vld [vmem:[%s2353_s3 + $0x5e] sm:$0x3]  ;;  %v1459_v5 = vld [vmem:[%s2353_s3 + $0x2c] sm:$0x3] }
 0x17d   : > { %2378 = vst [vmem:[#allocation8_spill] sm:$0xff] %v1817_v46  ;;  %2379 = vst [vmem:[#allocation9_spill] sm:$0xff] %v1820_v0  ;;  %v403_v48 = vmax.f32 %v1795_v39, %v1817_v46  ;;  %v412_v12 = vmax.f32 %v1798_v40, %v1820_v0 }
 0x17e   : > { %v422_v49 = vadd.f32 %v421_v1, %v1817_v46  ;;  %v431_v13 = vadd.f32 %v430_v8, %v1820_v0  ;;  %v1894_v1 = vpop.permute.xlu0 %758  ;;  %v1458_v8 = vld [vmem:[%s2353_s3 + $0x2a] sm:$0x3] }
 0x17f   : > { %v404_v50 = vmax.f32 %v402_v9, %v403_v48  ;;  %v413_v51 = vmax.f32 %v411_v47, %v412_v12  ;;  %v1899_v9 = vpop.permute.xlu1 %769  ;;  %v1461_v47 = vld [vmem:[%s2353_s3 + $0x30] sm:$0x3]  ;;  %v1460_v12 = vld [vmem:[%s2353_s3 + $0x2e] sm:$0x3] }
 0x180   : > { %v423_v52 = vrot.slane %v422_v49, 4  ;;  %v432_v53 = vrot.slane %v431_v13, 4 }
 0x181   : > { %v405_v54 = vrot.slane %v404_v50, 4  ;;  %v414_v55 = vrot.slane %v413_v51, 4 }
 0x182   : > { %v424_v56 = vadd.f32 %v423_v52, %v422_v49  ;;  %v433_v57 = vadd.f32 %v432_v53, %v431_v13  ;;  %v1904_v48 = vpop.permute.xlu0 %844  ;;  %v1463_v49 = vld [vmem:[%s2353_s3 + $0x34] sm:$0x3]  ;;  %v1464_v52 = vld [vmem:[%s2353_s3 + $0x36] sm:$0x3] }
 0x183   : > { %v406_v59 = vmax.f32 %v404_v50, %v405_v54  ;;  %v415_v60 = vmax.f32 %v413_v51, %v414_v55  ;;  %v1912_v13 = vpop.permute.xlu1 %780  ;;  %v1462_v50 = vld [vmem:[%s2353_s3 + $0x32] sm:$0x3] }
 0x184   : > { %v425_v61 = vrot.slane %v424_v56, 2  ;;  %v434_v62 = vrot.slane %v433_v57, 2 }
 0x185   : > { %v407_v63 = vrot.slane %v406_v59, 2  ;;  %v416_v3 = vrot.slane %v415_v60, 2 }
 0x186   : > { %v426_v4 = vadd.f32 %v425_v61, %v424_v56  ;;  %v435_v6 = vadd.f32 %v434_v62, %v433_v57  ;;  %v1917_v51 = vpop.permute.xlu0 %855 }
 0x187   : > { %v408_v10 = vmax.f32 %v406_v59, %v407_v63  ;;  %v417_v11 = vmax.f32 %v415_v60, %v416_v3  ;;  %v1922_v53 = vpop.permute.xlu1 %1022 }
 0x188   : > { %v427_v14 = vrot.slane %v426_v4, 1  ;;  %v436_v15 = vrot.slane %v435_v6, 1 }
 0x189   : > { %v409_v16 = vrot.slane %v408_v10, 1  ;;  %v418_v17 = vrot.slane %v417_v11, 1 }
 0x18a   : > { %v428_v18 = vadd.f32 %v427_v14, %v426_v4  ;;  %v437_v19 = vadd.f32 %v436_v15, %v435_v6  ;;  %v1924_v54 = vpop.permute.xlu0 %866 }
 0x18b   : > { %v410_v20 = vmax.f32 %v408_v10, %v409_v16  ;;  %v419_v21 = vmax.f32 %v417_v11, %v418_v17  ;;  %v1926_v55 = vpop.permute.xlu1 %673 }
 0x18c   : > { %v439_v22 = vmul.f32 0.03125, %v428_v18  ;;  %v440_v23 = vmul.f32 0.03125, %v437_v19 }
 0x18e   : > { %v1838_v24 = vsel %vm443_vm1, %v410_v20, %v439_v22  ;;  %v1840_v25 = vsel %vm443_vm1, %v419_v21, %v440_v23  ;;  %v1928_v56 = vpop.permute.xlu0 %1031  ;;  %v1963_v20 = vand.u32 127, %v441_v58  ;;  %v1559_v22 = vmov 1983009808  }
 0x18f   : > { %449 = vrot.lane.b32.xlu1 %v1840_v25, %s1553_s29  ;;  %447 = vrot.lane.b32.xlu0 %v1838_v24, %s1553_s29  ;;  %v1930_v57 = vpop.permute.xlu1 %877  ;;  %v460_v23 = vunpack.c.l.s4 %v1559_v22  ;;  %v1431_v22 = vld [vmem:[%s2354_s4 + $0x4] sm:$0xf] }
 0x190   : > { %2380 = vst [vmem:[#allocation10_spill] sm:$0xff] %v1930_v57  ;;  %2383 = vst [vmem:[#allocation13_spill] sm:$0xff] %v1963_v20  ;;  %vm453_vm2 = vcmp.lt.s32.totalorder %v1963_v20, 3  ;;  %vm474_vm3 = vcmp.lt.s32.totalorder %v1963_v20, 2  ;;  %vm495_vm4 = vcmp.lt.s32.totalorder %v1963_v20, 1  ;;  %vm516_vm5 = vcmp.lt.s32.totalorder %v1963_v20, 127 }
 0x191   : > { %vm537_vm6 = vcmp.lt.s32.totalorder %v1963_v20, 126  ;;  %vm558_vm7 = vcmp.lt.s32.totalorder %v1963_v20, 125 }
 0x192   : > { %v1932_v59 = vpop.permute.xlu0 %791 }
 0x193   : > { %470 = vrot.lane.b32.xlu1 %v1838_v24, %s1554_s30  ;;  %491 = vrot.lane.b32.xlu0 %v1838_v24, %s1555_s7  ;;  %v1934_v60 = vpop.permute.xlu1 %1119 }
 0x196   : > { %v1936_v61 = vpop.permute.xlu0 %1042 }
 0x197   : > { %472 = vrot.lane.b32.xlu1 %v1840_v25, %s1554_s30  ;;  %512 = vrot.lane.b32.xlu0 %v1838_v24, %s1556_s8  ;;  %v1938_v62 = vpop.permute.xlu1 %695 }
 0x19a   : > { %v1940_v63 = vpop.permute.xlu0 %1128 }
 0x19b   : > { %493 = vrot.lane.b32.xlu1 %v1840_v25, %s1555_s7  ;;  %533 = vrot.lane.b32.xlu0 %v1838_v24, %s1557_s9  ;;  %v1942_v3 = vpop.permute.xlu1 %888 }
 0x19c   : > { %2381 = vst [vmem:[#allocation11_spill] sm:$0xff] %v1942_v3 }
 0x19e   : > { %v1944_v4 = vpop.permute.xlu0 %802 }
 0x19f   : > { %514 = vrot.lane.b32.xlu1 %v1840_v25, %s1556_s8  ;;  %554 = vrot.lane.b32.xlu0 %v1838_v24, %s1558_s10  ;;  %v1946_v6 = vpop.permute.xlu1 %1139 }
 0x1a2   : > { %v1054_v10 = vpop.permute.xlu0 %1053 }
 0x1a3   : > { %535 = vrot.lane.b32.xlu1 %v1840_v25, %s1557_s9  ;;  %1247 = vperm.xlu0 %1518, %v1485_v29   ;;  %v1948_v11 = vpop.permute.xlu1 %1225  ;;  %s1560_s9 = smov 48  }
 0x1a6   : > { %v1950_v14 = vpop.permute.xlu0 %1216 }
 0x1a7   : > { %556 = vrot.lane.b32.xlu1 %v1840_v25, %s1558_s10  ;;  %1172 = vperm.xlu0 %1518, %v1479_v31   ;;  %v1952_v15 = vpop.permute.xlu1 %1064  ;;  %s1561_s10 = smov 32  }
 0x1aa   : > { %v1954_v16 = vpop.permute.xlu0 %899 }
 0x1ab   : > { %1086 = vperm.xlu1 %1519, %v1472_v33   ;;  %1183 = vperm.xlu0 %1518, %v1480_v35   ;;  %2382 = vst [vmem:[#allocation12_spill] sm:$0xff] %v1954_v16  ;;  %v1956_v17 = vpop.permute.xlu1 %1236  ;;  %v461_v33 = vunpack.c.0.s8 %v460_v23  ;;  %v1435_v16 = vld [vmem:[%s2354_s4 + $0x18] sm:$0xf] }
 0x1ae   : > { %v1958_v18 = vpop.permute.xlu0 %1150 }
 0x1af   : > { %1258 = vperm.xlu1 %1519, %v1486_v37   ;;  %1280 = vperm.xlu0 %1518, %v1488_v38   ;;  %v1960_v19 = vpop.permute.xlu1 %1161 }
 0x1b2   : > { %v1965_v21 = vpop.permute.xlu0 %1075 }
 0x1b3   : > { %1269 = vperm.xlu1 %1519, %v1487_v2   ;;  %941 = vperm.xlu0 %1518, %v1459_v5   ;;  %2384 = vst [vmem:[#allocation14_spill] sm:$0xff] %v1965_v21  ;;  %v1970_v5 = vsub.s32 %v461_v33, %v1835_v7 }
 0x1b7   : > { %932 = vperm.xlu1 %1519, %v1458_v8   ;;  %963 = vperm.xlu0 %1518, %v1461_v47  }
 0x1bb   : > { %952 = vperm.xlu1 %1519, %v1460_v12   ;;  %985 = vperm.xlu0 %1518, %v1463_v49  }
 0x1bf   : > { %974 = vperm.xlu1 %1519, %v1462_v50  }
 0x1c3   : > { %996 = vperm.xlu1 %1519, %v1464_v52   ;;  %v446_v52 = vld [vmem:[%s2354_s4] sm:$0xf] }
 0x201   : > { %v450_v29 = vpop.permute.xlu1 %449  ;;  %v448_v31 = vpop.permute.xlu0 %447 }
 0x202   : > { %v454_v35 = vsel %vm453_vm2, %v448_v31, %v450_v29  ;;  %v455_v37 = vsel %vm453_vm2, %v450_v29, %v448_v31 }
 0x203   : > { %v458_v58 = vcombine.low %v455_v37, %v454_v35 }
 0x205   : > { %v471_v38 = vpop.permute.xlu1 %470  ;;  %v492_v2 = vpop.permute.xlu0 %491  ;;  %v465_v50 = vrot.slane %v458_v58, %v1970_v5  ;;  %v1432_v58 = vld [vmem:[%s2354_s4 + $0x8] sm:$0xf] }
 0x207   : > { %v467_v37 = vmul.f32 %v465_v50, %v446_v52 }
 0x209   : > { %v473_v8 = vpop.permute.xlu1 %472  ;;  %v513_v23 = vpop.permute.xlu0 %512 }
 0x20a   : > { %v475_v47 = vsel %vm474_vm3, %v471_v38, %v473_v8  ;;  %v476_v12 = vsel %vm474_vm3, %v473_v8, %v471_v38 }
 0x20b   : > { %v479_v49 = vcombine.low %v476_v12, %v475_v47  ;;  %v1988_v12 = vmul.f32 %v1867_v32, %v1838_v24 }
 0x20d   : > { %v486_v7 = vrot.slane %v479_v49, %v1970_v5  ;;  %v494_v29 = vpop.permute.xlu1 %493  ;;  %v534_v50 = vpop.permute.xlu0 %533 }
 0x20e   : > { %v496_v31 = vsel %vm495_vm4, %v492_v2, %v494_v29  ;;  %v497_v33 = vsel %vm495_vm4, %v494_v29, %v492_v2  ;;  %v1992_v2 = vmul.f32 %v1867_v32, %v1840_v25  ;;  %v2014_v32 = vmul.f32 %v1899_v9, %v1838_v24 }
 0x20f   : > { %v500_v35 = vcombine.low %v497_v33, %v496_v31  ;;  %v488_v38 = vmul.f32 %v1431_v22, %v486_v7  ;;  %v1997_v22 = vmul.f32 %v1924_v54, %v1838_v24  ;;  %v2001_v7 = vmul.f32 %v1924_v54, %v1840_v25 }
 0x210   : > { %v2004_v31 = vrot.slane %v467_v37, %v1970_v5  ;;  %v2018_v33 = vmul.f32 %v1899_v9, %v1840_v25  ;;  %v2021_v54 = vmul.f32 %v1054_v10, %v1838_v24 }
 0x211   : > { %v507_v8 = vrot.slane %v500_v35, %v1970_v5  ;;  %v515_v47 = vpop.permute.xlu1 %514  ;;  %2385 = vst [vmem:[#allocation15_spill] sm:$0xff] %v1997_v22  ;;  %2386 = vst [vmem:[#allocation16_spill] sm:$0xff] %v2001_v7 }
 0x212   : > { %v517_v49 = vsel %vm516_vm5, %v513_v23, %v515_v47  ;;  %v518_v0 = vsel %vm516_vm5, %v515_v47, %v513_v23  ;;  %2387 = vst [vmem:[#allocation17_spill] sm:$0xff] %v2004_v31  ;;  %v2007_v23 = vrot.slane %v488_v38, %v1970_v5  ;;  %2388 = vst [vmem:[#allocation18_spill] sm:$0xff] %v2018_v33 }
 0x213   : > { %v509_v29 = vmul.f32 %v1432_v58, %v507_v8  ;;  %v521_v52 = vcombine.low %v517_v49, %v518_v0  ;;  %v1433_v0 = vld [vmem:[%s2354_s4 + $0x10] sm:$0xf]  ;;  %v2025_v38 = vmul.f32 %v1054_v10, %v1840_v25  ;;  %v2030_v47 = vmul.f32 %v1958_v18, %v1838_v24  ;;  %v1434_v10 = vld [vmem:[%s2354_s4 + $0x14] sm:$0xf] }
 0x214   : > { %v2059_v40 = vmul.f32 %v1922_v53, %v2004_v31  ;;  %v2070_v43 = vcombine.high %v2007_v23, %v2007_v23  ;;  %v1131_v20 = vmul.f32 %v1940_v63, %v2007_v23 }
 0x215   : > { %v528_v35 = vrot.slane %v521_v52, %v1970_v5  ;;  %v536_v37 = vpop.permute.xlu1 %535  ;;  %v2033_v9 = vrot.slane %v509_v29, %v1970_v5  ;;  %v2037_v52 = vmul.f32 %v1958_v18, %v1840_v25  ;;  %v610_v29 = vmul.f32 %v2007_v23, %v1846_v26 }
 0x216   : > { %v538_v58 = vsel %vm537_vm6, %v534_v50, %v536_v37  ;;  %v539_v8 = vsel %vm537_vm6, %v536_v37, %v534_v50  ;;  %v2044_v50 = vcombine.high %v2004_v31, %v2004_v31  ;;  %v2048_v37 = vmul.f32 %v1950_v14, %v2004_v31 }
 0x217   : > { %v530_v49 = vmul.f32 %v1433_v0, %v528_v35  ;;  %v542_v44 = vcombine.low %v538_v58, %v539_v8  ;;  %v555_v0 = vpop.permute.xlu0 %554  ;;  %v1122_v58 = vmul.f32 %v1934_v60, %v2004_v31  ;;  %v590_v8 = vmul.f32 %v2004_v31, %v1855_v28 }
 0x218   : > { %v2074_v7 = vcombine.high %v2033_v9, %v2033_v9  ;;  %v1142_v3 = vmul.f32 %v1946_v6, %v2033_v9 }
 0x219   : > { %v549_v35 = vrot.slane %v542_v44, %v1970_v5  ;;  %v557_v18 = vpop.permute.xlu1 %556  ;;  %v2062_v42 = vrot.slane %v530_v49, %v1970_v5  ;;  %v2078_v49 = vmul.f32 %v1878_v36, %v2004_v31 }
 0x21a   : > { %v559_v46 = vsel %vm558_vm7, %v555_v0, %v557_v18  ;;  %v560_v44 = vsel %vm558_vm7, %v557_v18, %v555_v0  ;;  %v2085_v0 = vmul.f32 %v1950_v14, %v2044_v50  ;;  %v612_v18 = vadd.f32 %v610_v29, %v590_v8 }
 0x21b   : > { %v551_v39 = vmul.f32 %v1434_v10, %v549_v35  ;;  %v563_v41 = vcombine.low %v559_v46, %v560_v44  ;;  %v632_v46 = vmul.f32 %v2033_v9, %v1852_v27  ;;  %v2091_v10 = vmul.f32 %v1886_v45, %v2004_v31 }
 0x21c   : > { %v591_v14 = vmul.f32 %v2044_v50, %v1855_v28  ;;  %v2103_v29 = vcombine.high %v2062_v42, %v2062_v42  ;;  %v665_v31 = vmul.f32 %v2062_v42, %v1861_v30  ;;  %v633_v28 = vmul.f32 %v2074_v7, %v1852_v27 }
 0x21d   : > { %2389 = vst [vmem:[#allocation19_spill] sm:$0xff] %v2091_v10  ;;  %v2094_v35 = vrot.slane %v551_v39, %v1970_v5  ;;  %v570_v44 = vrot.slane %v563_v41, %v1970_v5  ;;  %v634_v8 = vadd.f32 %v632_v46, %v612_v18  ;;  %v611_v39 = vmul.f32 %v2070_v43, %v1846_v26 }
 0x21e   : > { %v1132_v41 = vmul.f32 %v1940_v63, %v2070_v43  ;;  %v1123_v63 = vmul.f32 %v1934_v60, %v2044_v50  ;;  %v1026_v27 = vmul.f32 %v1922_v53, %v2044_v50  ;;  %v1133_v10 = vadd.f32 %v1131_v20, %v1122_v58 }
 0x21f   : > { %v572_v22 = vmul.f32 %v1435_v16, %v570_v44  ;;  %v2117_v57 = vcombine.high %v2094_v35, %v2094_v35  ;;  %v645_v18 = vadd.f32 %v1988_v12, %v634_v8  ;;  %v687_v46 = vmul.f32 %v2094_v35, %v1926_v55 }
 0x220   : > { %v613_v26 = vadd.f32 %v611_v39, %v591_v14  ;;  %v1143_v44 = vmul.f32 %v1946_v6, %v2074_v7  ;;  %v666_v12 = vmul.f32 %v2103_v29, %v1861_v30  ;;  %v1228_v14 = vmul.f32 %v1948_v11, %v2007_v23 }
 0x221   : > { %v2123_v16 = vrot.slane %v572_v22, %v1970_v5  ;;  %v667_v33 = vadd.f32 %v665_v31, %v645_v18  ;;  %v1134_v8 = vadd.f32 %v1132_v41, %v1123_v63  ;;  %v1144_v39 = vadd.f32 %v1142_v3, %v1133_v10 }
 0x222   : > { %v635_v21 = vadd.f32 %v633_v28, %v613_v26  ;;  %v1248_v22 = vpop.permute.xlu0 %1247  ;;  %v688_v31 = vmul.f32 %v2117_v57, %v1926_v55  ;;  %v1034_v58 = vmul.f32 %v1928_v56, %v2007_v23  ;;  %v742_v41 = vmul.f32 %v1878_v36, %v2044_v50 }
 0x223   : > { %v709_v60 = vmul.f32 %v2123_v16, %v1938_v62  ;;  %v2139_v6 = vcombine.high %v2123_v16, %v2123_v16  ;;  %v689_v53 = vadd.f32 %v687_v46, %v667_v33  ;;  %v1145_v30 = vadd.f32 %v1143_v44, %v1134_v8 }
 0x224   : > { %v646_v20 = vadd.f32 %v1992_v2, %v635_v21  ;;  %v2150_v28 = vmul.f32 %v1886_v45, %v2044_v50  ;;  %v750_v21 = vmul.f32 %v1873_v34, %v2007_v23  ;;  %v1229_v55 = vmul.f32 %v1948_v11, %v2070_v43 }
 0x225   : > { %v711_v18 = vadd.f32 %v709_v60, %v689_v53  ;;  %v710_v3 = vmul.f32 %v2139_v6, %v1938_v62  ;;  %v1230_v2 = vadd.f32 %v1228_v14, %v2048_v37  ;;  %v1239_v36 = vmul.f32 %v1956_v17, %v2033_v9 }
 0x226   : > { %v668_v26 = vadd.f32 %v666_v12, %v646_v20  ;;  %v2161_v33 = vpop.permute.xlu0 %1172  ;;  %v1035_v45 = vmul.f32 %v1928_v56, %v2070_v43  ;;  %v1240_v10 = vmul.f32 %v1956_v17, %v2074_v7  ;;  %v1155_v62 = vadd.f32 %v2030_v47, %v1144_v39 }
 0x227   : > { %714 = vrot.lane.b32.xlu0 %v711_v18, %s1560_s9  ;;  %v1045_v11 = vmul.f32 %v1936_v61, %v2033_v9  ;;  %v1156_v37 = vadd.f32 %v2037_v52, %v1145_v30  ;;  %v1164_v63 = vmul.f32 %v1960_v19, %v2062_v42  ;;  %v1165_v44 = vmul.f32 %v1960_v19, %v2103_v29 }
 0x228   : > { %v690_v46 = vadd.f32 %v688_v31, %v668_v26  ;;  %v761_v56 = vmul.f32 %v1894_v1, %v2033_v9  ;;  %v1036_v47 = vadd.f32 %v1034_v58, %v2059_v40  ;;  %v1046_v14 = vmul.f32 %v1936_v61, %v2074_v7 }
 0x229   : > { %v752_v8 = vadd.f32 %v750_v21, %v2078_v49  ;;  %v1231_v52 = vadd.f32 %v1229_v55, %v2085_v0  ;;  %v1241_v60 = vadd.f32 %v1239_v36, %v1230_v2  ;;  %v1250_v39 = vmul.f32 %v1248_v22, %v1838_v24 }
 0x22a   : > { %v712_v17 = vadd.f32 %v710_v3, %v690_v46  ;;  %v2177_v12 = vpop.permute.xlu1 %1086  ;;  %v1037_v53 = vadd.f32 %v1035_v45, %v1026_v27  ;;  %v2185_v19 = vpop.permute.xlu0 %1183  ;;  %v1251_v20 = vmul.f32 %v1248_v22, %v1840_v25  ;;  %v1047_v31 = vadd.f32 %v1045_v11, %v1036_v47 }
 0x22b   : > { %v763_v30 = vadd.f32 %v761_v56, %v752_v8  ;;  %v783_v40 = vmul.f32 %v1912_v13, %v2062_v42  ;;  %v1242_v58 = vadd.f32 %v1240_v10, %v1231_v52  ;;  %v2190_v61 = vadd.f32 %v1164_v63, %v1155_v62 }
 0x22c   : > { %716 = vrot.lane.b32.xlu1 %v712_v17, %s1560_s9  ;;  %v751_v49 = vmul.f32 %v1873_v34, %v2070_v43  ;;  %v762_v0 = vmul.f32 %v1894_v1, %v2074_v7  ;;  %v2196_v27 = vadd.f32 %v1165_v44, %v1156_v37  ;;  %v1048_v18 = vadd.f32 %v1046_v14, %v1037_v53  ;;  %v2390_v37 = vld [vmem:[#allocation14_spill] sm:$0xff]  ;;  %v2392_v14 = vld [vmem:[#allocation19_spill] sm:$0xff] }
 0x22d   : > { %v774_v22 = vadd.f32 %v2014_v32, %v763_v30  ;;  %v794_v26 = vmul.f32 %v1932_v59, %v2094_v35  ;;  %v2203_v21 = vadd.f32 %v1250_v39, %v1241_v60  ;;  %v1067_v55 = vmul.f32 %v1952_v15, %v2062_v42  ;;  %v2391_v17 = vld [vmem:[#allocation18_spill] sm:$0xff] }
 0x22e   : > { %v2201_v3 = vpop.permute.xlu1 %1258  ;;  %v1068_v34 = vmul.f32 %v1952_v15, %v2103_v29  ;;  %v753_v2 = vadd.f32 %v751_v49, %v742_v41  ;;  %v2209_v1 = vpop.permute.xlu0 %1280  ;;  %v2211_v36 = vadd.f32 %v1251_v20, %v1242_v58  ;;  %v1058_v32 = vadd.f32 %v2021_v54, %v1047_v31  ;;  %v2394_v49 = vld [vmem:[#allocation11_spill] sm:$0xff] }
 0x22f   : > { %v785_v45 = vadd.f32 %v783_v40, %v774_v22  ;;  %v805_v10 = vmul.f32 %v1944_v4, %v2123_v16  ;;  %v784_v46 = vmul.f32 %v1912_v13, %v2103_v29  ;;  %v847_v11 = vmul.f32 %v1904_v48, %v2007_v23 }
 0x230   : > { %v764_v62 = vadd.f32 %v762_v0, %v753_v2  ;;  %v858_v15 = vmul.f32 %v1917_v51, %v2033_v9  ;;  %v1059_v41 = vadd.f32 %v2025_v38, %v1048_v18  ;;  %v1078_v63 = vmul.f32 %v2390_v37, %v2094_v35 }
 0x231   : > { %v1079_v54 = vmul.f32 %v2390_v37, %v2117_v57  ;;  %v796_v44 = vadd.f32 %v794_v26, %v785_v45  ;;  %v795_v13 = vmul.f32 %v1932_v59, %v2117_v57  ;;  %v849_v8 = vadd.f32 %v847_v11, %v2392_v14  ;;  %v2393_v59 = vld [vmem:[#allocation10_spill] sm:$0xff]  ;;  %v2395_v26 = vld [vmem:[#allocation15_spill] sm:$0xff] }
 0x232   : > { %v2227_v56 = vpop.permute.xlu1 %1269  ;;  %v775_v47 = vadd.f32 %v2391_v17, %v764_v62  ;;  %v848_v52 = vmul.f32 %v1904_v48, %v2070_v43  ;;  %v942_v38 = vpop.permute.xlu0 %941  ;;  %v1175_v60 = vmul.f32 %v2161_v33, %v2094_v35  ;;  %v806_v53 = vmul.f32 %v1944_v4, %v2139_v6  ;;  %v2398_v17 = vld [vmem:[#allocation16_spill] sm:$0xff] }
 0x233   : > { %v807_v39 = vadd.f32 %v805_v10, %v796_v44  ;;  %v859_v20 = vmul.f32 %v1917_v51, %v2074_v7  ;;  %v860_v30 = vadd.f32 %v858_v15, %v849_v8  ;;  %v880_v40 = vmul.f32 %v2393_v59, %v2062_v42 }
 0x234   : > { %v786_v31 = vadd.f32 %v784_v46, %v775_v47  ;;  %v850_v58 = vadd.f32 %v848_v52, %v2150_v28  ;;  %v2246_v48 = vmul.f32 %v2161_v33, %v2117_v57  ;;  %v891_v0 = vmul.f32 %v2394_v49, %v2094_v35  ;;  %v2396_v28 = vld [vmem:[#allocation17_spill] sm:$0xff]  ;;  %v2397_v33 = vld [vmem:[#allocation12_spill] sm:$0xff] }
 0x235   : > { %811 = vrot.lane.b32.xlu0 %v807_v39, %s1561_s10  ;;  %v881_v4 = vmul.f32 %v2393_v59, %v2103_v29  ;;  %v944_v51 = vmul.f32 %v942_v38, %v2007_v23  ;;  %v871_v2 = vadd.f32 %v2395_v26, %v860_v30  ;;  %v902_v62 = vmul.f32 %v2397_v33, %v2123_v16 }
 0x236   : > { %v933_v18 = vpop.permute.xlu1 %932  ;;  %v797_v22 = vadd.f32 %v795_v13, %v786_v31  ;;  %v861_v45 = vadd.f32 %v859_v20, %v850_v58  ;;  %v892_v46 = vmul.f32 %v2394_v49, %v2117_v57  ;;  %v945_v11 = vmul.f32 %v942_v38, %v2070_v43  ;;  %v964_v37 = vpop.permute.xlu0 %963 }
 0x237   : > { %v935_v10 = vmul.f32 %v933_v18, %v2396_v28  ;;  %v936_v15 = vmul.f32 %v933_v18, %v2044_v50  ;;  %v882_v23 = vadd.f32 %v880_v40, %v871_v2  ;;  %v1069_v14 = vadd.f32 %v1067_v55, %v1058_v32 }
 0x238   : > { %v808_v44 = vadd.f32 %v806_v53, %v797_v22  ;;  %v872_v47 = vadd.f32 %v2398_v17, %v861_v45  ;;  %v1070_v8 = vadd.f32 %v1068_v34, %v1059_v41  ;;  %v903_v52 = vmul.f32 %v2397_v33, %v2139_v6 }
 0x239   : > { %v946_v13 = vadd.f32 %v944_v51, %v935_v10  ;;  %v947_v39 = vadd.f32 %v945_v11, %v936_v15  ;;  %v893_v31 = vadd.f32 %v891_v0, %v882_v23  ;;  %v1177_v38 = vadd.f32 %v1175_v60, %v2190_v61 }
 0x23a   : > { %v953_v20 = vpop.permute.xlu1 %952  ;;  %813 = vrot.lane.b32.xlu1 %v808_v44, %s1561_s10  ;;  %v883_v30 = vadd.f32 %v881_v4, %v872_v47  ;;  %v1089_v53 = vmul.f32 %v2177_v12, %v2123_v16  ;;  %v966_v55 = vmul.f32 %v964_v37, %v1838_v24  ;;  %v967_v34 = vmul.f32 %v964_v37, %v1840_v25  ;;  %v986_v61 = vpop.permute.xlu0 %985  ;;  %s251_s10 = scalar_lea.vmem %s2356_s6, %s1494_s23 }
 0x23b   : > { %v955_v43 = vmul.f32 %v953_v20, %v2033_v9  ;;  %v956_v50 = vmul.f32 %v953_v20, %v2074_v7  ;;  %v904_v32 = vadd.f32 %v902_v62, %v893_v31  ;;  %v1080_v58 = vadd.f32 %v1078_v63, %v1069_v14  ;;  %v2399_v14 = vld [vmem:[#allocation13_spill] sm:$0xff] }
 0x23c   : > { %v894_v41 = vadd.f32 %v892_v46, %v883_v30  ;;  %v1081_v49 = vadd.f32 %v1079_v54, %v1070_v8  ;;  %v1090_v9 = vmul.f32 %v2177_v12, %v2139_v6  ;;  %v1261_v7 = vmul.f32 %v2201_v3, %v2062_v42 }
 0x23d   : > { %v957_v59 = vadd.f32 %v955_v43, %v946_v13  ;;  %v958_v40 = vadd.f32 %v956_v50, %v947_v39  ;;  %908 = vrot.lane.b32.xlu0 %v904_v32, %s1562_s11  ;;  %v1091_v51 = vadd.f32 %v1089_v53, %v1080_v58  ;;  %v1186_v63 = vmul.f32 %v2185_v19, %v2123_v16  ;;  %v1449_v50 = vld [vmem:[%s2355_s5 + $0x4] sm:$0xf]  ;;  %v1457_v58 = vld [vmem:[%s2355_s5 + $0x8] sm:$0xf] }
 0x23e   : > { %v975_v60 = vpop.permute.xlu1 %974  ;;  %v905_v0 = vadd.f32 %v903_v52, %v894_v41  ;;  %v1187_v54 = vmul.f32 %v2185_v19, %v2139_v6  ;;  %v1262_v18 = vmul.f32 %v2201_v3, %v2103_v29  ;;  %v1272_v22 = vmul.f32 %v2227_v56, %v2094_v35 }
 0x23f   : > { %v968_v24 = vadd.f32 %v966_v55, %v957_v59  ;;  %v969_v4 = vadd.f32 %v967_v34, %v958_v40  ;;  %v977_v25 = vmul.f32 %v975_v60, %v2062_v42  ;;  %v978_v12 = vmul.f32 %v975_v60, %v2103_v29  ;;  %v713_v55 = vld [vmem:[%s2355_s5] sm:$0xf] }
 0x240   : > { %910 = vrot.lane.b32.xlu1 %v905_v0, %s1562_s11  ;;  %v988_v26 = vmul.f32 %v986_v61, %v2094_v35  ;;  %v1092_v42 = vadd.f32 %v1090_v9, %v1081_v49  ;;  %v1263_v45 = vadd.f32 %v1261_v7, %v2203_v21  ;;  %v989_v28 = vmul.f32 %v986_v61, %v2117_v57 }
 0x241   : > { %v979_v2 = vadd.f32 %v977_v25, %v968_v24  ;;  %v980_v10 = vadd.f32 %v978_v12, %v969_v4  ;;  %v1273_v19 = vmul.f32 %v2227_v56, %v2117_v57  ;;  %1095 = vrot.lane.b32.xlu0 %v1091_v51, %s1563_s12  ;;  %v1178_v35 = vadd.f32 %v2246_v48, %v2196_v27 }
 0x242   : > { %v997_v33 = vpop.permute.xlu1 %996  ;;  %v1188_v11 = vadd.f32 %v1186_v63, %v1177_v38  ;;  %v1264_v21 = vadd.f32 %v1262_v18, %v2211_v36  ;;  %v1274_v15 = vadd.f32 %v1272_v22, %v1263_v45  ;;  %v1283_v57 = vmul.f32 %v2209_v1, %v2123_v16  ;;  %v1465_v63 = vld [vmem:[%s2355_s5 + $0xc] sm:$0xf]  ;;  %v1473_v22 = vld [vmem:[%s2355_s5 + $0x10] sm:$0xf] }
 0x243   : > { %v990_v29 = vadd.f32 %v988_v26, %v979_v2  ;;  %v999_v3 = vmul.f32 %v997_v33, %v2123_v16  ;;  %v1000_v62 = vmul.f32 %v997_v33, %v2139_v6  ;;  %v991_v46 = vadd.f32 %v989_v28, %v980_v10  ;;  %v1481_v28 = vld [vmem:[%s2355_s5 + $0x14] sm:$0xf] }
 0x244   : > { %1097 = vrot.lane.b32.xlu1 %v1092_v42, %s1563_s12  ;;  %v1189_v23 = vadd.f32 %v1187_v54, %v1178_v35  ;;  %v1275_v56 = vadd.f32 %v1273_v19, %v1264_v21  ;;  %v1284_v47 = vmul.f32 %v2209_v1, %v2139_v6  ;;  %v1285_v27 = vadd.f32 %v1283_v57, %v1274_v15  ;;  %v1489_v21 = vld [vmem:[%s2355_s5 + $0x18] sm:$0xf] }
 0x245   : > { %v1001_v37 = vadd.f32 %v999_v3, %v990_v29  ;;  %v1002_v44 = vadd.f32 %v1000_v62, %v991_v46  ;;  %1192 = vrot.lane.b32.xlu0 %v1188_v11, %s1564_s13  ;;  %vm718_vm8 = vcmp.lt.s32.totalorder %v2399_v14, 48  ;;  %vm815_vm9 = vcmp.lt.s32.totalorder %v2399_v14, 32 }
 0x246   : > { %v1286_v36 = vadd.f32 %v1284_v47, %v1275_v56  ;;  %vm912_vm10 = vcmp.lt.s32.totalorder %v2399_v14, 16  ;;  %vm1099_vm11 = vcmp.lt.s32.totalorder %v2399_v14, 112  ;;  %vm1196_vm12 = vcmp.lt.s32.totalorder %v2399_v14, 96 }
 0x247   : > { %v1007_v17 = vcombine.low %v1001_v37, %v1002_v44  ;;  %vm1293_vm13 = vcmp.lt.s32.totalorder %v2399_v14, 80 }
 0x248   : > { %1194 = vrot.lane.b32.xlu1 %v1189_v23, %s1564_s13 }
 0x249   : > { %1289 = vrot.lane.b32.xlu0 %v1285_v27, %s1565_s14  ;;  %v1014_v0 = vrot.slane %v1007_v17, %v1970_v5 }
 0x24b   : > { %v1016_v42 = vmul.f32 %v1465_v63, %v1014_v0  ;;  %v2405_v0 = vld [vmem:[#allocation3_spill] sm:$0xff] }
 0x24c   : > { %1291 = vrot.lane.b32.xlu1 %v1286_v36, %s1565_s14 }
 0x299   : > { %v715_v48 = vpop.permute.xlu0 %714 }
 0x29e   : > { %v717_v13 = vpop.permute.xlu1 %716 }
 0x29f   : > { %v719_v16 = vsel %vm718_vm8, %v715_v48, %v717_v13  ;;  %v720_v52 = vsel %vm718_vm8, %v717_v13, %v715_v48 }
 0x2a0   : > { %v723_v30 = vcombine.low %v720_v52, %v719_v16 }
 0x2a2   : > { %v730_v38 = vrot.slane %v723_v30, %v1970_v5 }
 0x2a4   : > { %v732_v49 = vmul.f32 %v730_v38, %v713_v55 }
 0x2a7   : > { %v812_v8 = vpop.permute.xlu0 %811 }
 0x2ac   : > { %v814_v39 = vpop.permute.xlu1 %813 }
 0x2ad   : > { %v816_v20 = vsel %vm815_vm9, %v812_v8, %v814_v39  ;;  %v817_v31 = vsel %vm815_vm9, %v814_v39, %v812_v8 }
 0x2ae   : > { %v820_v6 = vcombine.low %v817_v31, %v816_v20 }
 0x2af   : > { %v909_v43 = vpop.permute.xlu0 %908 }
 0x2b0   : > { %v827_v1 = vrot.slane %v820_v6, %v1970_v5 }
 0x2b2   : > { %v911_v53 = vpop.permute.xlu1 %910  ;;  %v829_v41 = vmul.f32 %v1449_v50, %v827_v1 }
 0x2b3   : > { %v913_v34 = vsel %vm912_vm10, %v909_v43, %v911_v53  ;;  %v914_v32 = vsel %vm912_vm10, %v911_v53, %v909_v43  ;;  %v1096_v40 = vpop.permute.xlu0 %1095 }
 0x2b4   : > { %v917_v59 = vcombine.low %v914_v32, %v913_v34  ;;  %v830_v24 = vadd.f32 %v829_v41, %v732_v49  ;;  %v2400_v34 = vld [vmem:[#allocation4_spill] sm:$0xff]  ;;  %v2401_v41 = vld [vmem:[#allocation2_spill] sm:$0xff] }
 0x2b5   : > { %v2403_v49 = vld [vmem:[#allocation8_spill] sm:$0xff] }
 0x2b6   : > { %v924_v9 = vrot.slane %v917_v59, %v1970_v5  ;;  %v1098_v7 = vpop.permute.xlu1 %1097 }
 0x2b7   : > { %v1100_v61 = vsel %vm1099_vm11, %v1096_v40, %v1098_v7  ;;  %v1101_v60 = vsel %vm1099_vm11, %v1098_v7, %v1096_v40  ;;  %v1193_v51 = vpop.permute.xlu0 %1192  ;;  %v2402_v40 = vld [vmem:[#allocation6_spill] sm:$0xff] }
 0x2b8   : > { %v926_v4 = vmul.f32 %v1457_v58, %v924_v9  ;;  %v1104_v25 = vcombine.low %v1100_v61, %v1101_v60  ;;  %v2404_v61 = vld [vmem:[#allocation5_spill] sm:$0xff] }
 0x2ba   : > { %v927_v54 = vadd.f32 %v926_v4, %v830_v24  ;;  %v1111_v12 = vrot.slane %v1104_v25, %v1970_v5  ;;  %v1195_v18 = vpop.permute.xlu1 %1194  ;;  %v2406_v4 = vld [vmem:[#allocation7_spill] sm:$0xff] }
 0x2bb   : > { %v1197_v26 = vsel %vm1196_vm12, %v1193_v51, %v1195_v18  ;;  %v1198_v2 = vsel %vm1196_vm12, %v1195_v18, %v1193_v51  ;;  %v1290_v29 = vpop.permute.xlu0 %1289  ;;  %v2407_v51 = vld [vmem:[#allocation9_spill] sm:$0xff] }
 0x2bc   : > { %v1201_v45 = vcombine.low %v1197_v26, %v1198_v2  ;;  %v1017_v10 = vadd.f32 %v1016_v42, %v927_v54  ;;  %v1113_v33 = vmul.f32 %v1473_v22, %v1111_v12 }
 0x2be   : > { %v1208_v19 = vrot.slane %v1201_v45, %v1970_v5  ;;  %v1292_v3 = vpop.permute.xlu1 %1291  ;;  %v1114_v15 = vadd.f32 %v1113_v33, %v1017_v10 }
 0x2bf   : > { %v1294_v62 = vsel %vm1293_vm13, %v1290_v29, %v1292_v3  ;;  %v1295_v35 = vsel %vm1293_vm13, %v1292_v3, %v1290_v29 }
 0x2c0   : > { %v1210_v46 = vmul.f32 %v1481_v28, %v1208_v19  ;;  %v1298_v11 = vcombine.low %v1294_v62, %v1295_v35 }
 0x2c2   : > { %v1305_v37 = vrot.slane %v1298_v11, %v1970_v5  ;;  %v1211_v44 = vadd.f32 %v1210_v46, %v1114_v15 }
 0x2c4   : > { %v1307_v23 = vmul.f32 %v1489_v21, %v1305_v37 }
 0x2c6   : > { %v1308_v57 = vadd.f32 %v1307_v23, %v1211_v44 }
 0x2c8   : > { %v1316_v56 = vrot.slane %v1308_v57, %v1970_v5 }
 0x2ca   : > { %v1317_v17 = vcombine.high %v1316_v56, %v1316_v56  ;;  %v1321_v47 = vsel %vm1320_vm14, %v1316_v56, 0.0 }
 0x2cb   : > { %v1322_v27 = vrot.slane %v1321_v47, 4 }
 0x2cc   : > { %v1328_v36 = vsel %vm1320_vm14, %v1317_v17, 0.0 }
 0x2cd   : > { %v1323_v48 = vadd.f32 %v1322_v27, %v1321_v47  ;;  %v1329_v13 = vrot.slane %v1328_v36, 4 }
 0x2cf   : > { %v1324_v14 = vrot.slane %v1323_v48, 2  ;;  %v1330_v8 = vadd.f32 %v1329_v13, %v1328_v36 }
 0x2d1   : > { %v1325_v16 = vadd.f32 %v1324_v14, %v1323_v48  ;;  %v1331_v52 = vrot.slane %v1330_v8, 2 }
 0x2d3   : > { %v1326_v39 = vrot.slane %v1325_v16, 1  ;;  %v1332_v20 = vadd.f32 %v1331_v52, %v1330_v8 }
 0x2d5   : > { %v1327_v31 = vadd.f32 %v1326_v39, %v1325_v16  ;;  %v1333_v30 = vrot.slane %v1332_v20, 1 }
 0x2d7   : > { %v1334_v6 = vadd.f32 %v1333_v30, %v1332_v20  ;;  %v1490_v1 = vmul.f32 -1.442695, %v1327_v31 }
 0x2d9   : > { %1536 = vpow2.f32 %v1490_v1  ;;  %v1491_v43 = vmul.f32 -1.442695, %v1334_v6 }
 0x2db   : > { %1538 = vpow2.f32 %v1491_v43 }
 0x2e3   : > { %v1537_v5 = vpop.eup %1536 }
 0x2e4   : > { %v1341_v50 = vadd.f32 1.0, %v1537_v5 }
 0x2e5   : > { %v1539_v38 = vpop.eup %1538 }
 0x2e6   : > { %v1342_v53 = vadd.f32 1.0, %v1539_v38  ;;  %1540 = vrcp.f32 %v1341_v50 }
 0x2e8   : > { %1542 = vrcp.f32 %v1342_v53 }
 0x2f0   : > { %v1541_v55 = vpop.eup %1540 }
 0x2f1   : > { %v1347_v32 = vmul.f32 %v1541_v55, %v2400_v34  ;;  %v1349_v59 = vmul.f32 %v1541_v55, %v2401_v41  ;;  %v1351_v58 = vmul.f32 %v1541_v55, %v2402_v40  ;;  %v1353_v9 = vmul.f32 %v1541_v55, %v2403_v49 }
 0x2f2   : > { %v1543_v7 = vpop.eup %1542 }
 0x2f3   : > { %v1348_v60 = vmul.f32 %v1543_v7, %v2404_v61  ;;  %v1350_v24 = vmul.f32 %v1543_v7, %v2405_v0  ;;  %v1352_v25 = vmul.f32 %v1543_v7, %v2406_v4  ;;  %v1354_v63 = vmul.f32 %v1543_v7, %v2407_v51  ;;  %1355 = vst [vmem:[%s251_s10] sm:$0xff] %v1347_v32 }
 0x2f4   : > { %1357 = vst [vmem:[%s251_s10 + $0x10] sm:$0xff] %v1349_v59  ;;  %1359 = vst [vmem:[%s251_s10 + $0x20] sm:$0xff] %v1351_v58 }
 0x2f5   : > { %1361 = vst [vmem:[%s251_s10 + $0x30] sm:$0xff] %v1353_v9  ;;  %1356 = vst [vmem:[%s251_s10 + $0x8] sm:$0xff] %v1348_v60 }
 0x2f6   : > { %1358 = vst [vmem:[%s251_s10 + $0x18] sm:$0xff] %v1350_v24  ;;  %1360 = vst [vmem:[%s251_s10 + $0x28] sm:$0xff] %v1352_v25 }
 0x2f7   : > { %1362 = vst [vmem:[%s251_s10 + $0x38] sm:$0xff] %v1354_v63 }
 0x2f8 PF: > { %s16_s21 = sadd.s32 1, %s1550_s21  }
 0x2f9   : > { %p13_p4 = scmp.ge.s32.totalorder %s16_s21, 4  }
 0x2fb   :  { %15 = sbr.rel (!%p13_p4) target bundleno = 1 (0x1), region = 133 }

</bundles_post_ra>
